<compile_context>
chip_gen: v6e
topology: v6e:2x2x1
jax: 0.10.0
libtpu: 0.0.40
codegen_flags: <defaults>
</compile_context>

<pallas_src>
import functools
import math

import jax
import jax.numpy as jnp
from jax.experimental import pallas as pl
from jax.experimental.pallas import tpu as pltpu


def _layer_norm(x, a, b, eps):
    # PyTorch-spec LayerNorm: mean over last dim, unbiased std (N-1), eps on std.
    d = x.shape[-1]
    mean = jnp.mean(x, axis=-1, keepdims=True)
    var = jnp.sum((x - mean) ** 2, axis=-1, keepdims=True) / (d - 1)
    std = jnp.sqrt(var)
    return a * (x - mean) / (std + eps) + b


def _transformer_block_kernel(
    x_ref, mask_ref,
    ln0_a_ref, ln0_b_ref,
    wq_ref, bq_ref, wk_ref, bk_ref, wv_ref, bv_ref, wo_ref, bo_ref,
    ln1_a_ref, ln1_b_ref,
    w1_ref, b1_ref, w2_ref, b2_ref,
    out_ref,
    *, n_heads, eps):
    xb = x_ref[...]                              # (Bt, S, D) f32
    Bt, S, D = xb.shape
    Dh = D // n_heads
    inv_sqrt_dh = 1.0 / math.sqrt(Dh)

    # Flatten batch rows for the big linears (leading-dim merge, no relayout).
    x = xb.reshape(Bt * S, D)

    # Hoisted mask predicate, shared by every head (int8 -> bool once).
    masked = mask_ref[...].astype(jnp.int32) == 0          # (Bt, S, S)

    # ---- sublayer 0: x + SelfAttention(LayerNorm(x)) -------------------------
    h = _layer_norm(x, ln0_a_ref[...], ln0_b_ref[...], eps)
    hb = h.astype(jnp.bfloat16)                  # bf16 MXU operands, f32 accumulate

    q = jnp.dot(hb, wq_ref[...], preferred_element_type=jnp.float32) + bq_ref[...]
    k = jnp.dot(hb, wk_ref[...], preferred_element_type=jnp.float32) + bk_ref[...]
    v = jnp.dot(hb, wv_ref[...], preferred_element_type=jnp.float32) + bv_ref[...]
    qb = q.astype(jnp.bfloat16)
    kb = k.astype(jnp.bfloat16)
    vb = v.astype(jnp.bfloat16)

    wo = wo_ref[...]                             # (D, D) bf16, loaded once
    acc = jnp.zeros((Bt * S, D), jnp.float32)
    for hh in range(n_heads):                    # static unrolled head loop (small H)
        sl = slice(hh * Dh, (hh + 1) * Dh)
        # (Bt*S, Dh) -> (Bt, S, Dh): leading-dim split only (S multiple of 8).
        q_h = qb[:, sl].reshape(Bt, S, Dh)
        k_h = kb[:, sl].reshape(Bt, S, Dh)
        v_h = vb[:, sl].reshape(Bt, S, Dh)
        # scores = q_h @ k_h^T, batched over the Bt rows of this tile.
        s = jnp.einsum("bqd,bkd->bqk", q_h, k_h,
                       preferred_element_type=jnp.float32) * inv_sqrt_dh
        s = jnp.where(masked, -1e9, s)
        s = s - jnp.max(s, axis=-1, keepdims=True)
        p = jnp.exp(s)
        p = p * pl.reciprocal(jnp.sum(p, axis=-1, keepdims=True), approx=True)
        o_h = jnp.einsum("bqk,bkd->bqd", p.astype(jnp.bfloat16), v_h,
                         preferred_element_type=jnp.float32)        # (Bt, S, Dh)
        # fold output projection: concat(o_h) @ Wo == sum_h o_h @ Wo[h*Dh:(h+1)*Dh]
        acc = acc + jnp.dot(o_h.reshape(Bt * S, Dh).astype(jnp.bfloat16),
                            wo[sl, :], preferred_element_type=jnp.float32)
    x1 = x + acc + bo_ref[...]

    # ---- sublayer 1: x + FeedForward(LayerNorm(x)) ---------------------------
    h2 = _layer_norm(x1, ln1_a_ref[...], ln1_b_ref[...], eps)
    hidden = jnp.maximum(
        jnp.dot(h2.astype(jnp.bfloat16), w1_ref[...],
                preferred_element_type=jnp.float32) + b1_ref[...],
        0.0)
    ff = jnp.dot(hidden.astype(jnp.bfloat16), w2_ref[...],
                 preferred_element_type=jnp.float32) + b2_ref[...]

    out_ref[...] = (x1 + ff).reshape(Bt, S, D).astype(out_ref.dtype)


def transformer_block(x, mask, params, *, n_heads, eps=1e-6, block_b=None):
    """x: f32 [B, S, D]; mask: [B, S, S] (nonzero keep / 0 mask) -> f32 [B, S, D]."""
    B, S, D = x.shape
    F = params["w1"].shape[1]

    if block_b is None:
        # Fill the MXU M dimension: smallest divisor of B with block_b*S >= 256,
        # else the whole batch in one step.
        block_b = B
        for bt in range(1, B + 1):
            if B % bt == 0 and bt * S >= 256:
                block_b = bt
                break
    assert B % block_b == 0, "block_b must divide the batch"
    Bt = block_b

    # Mask as int8 (4x less HBM traffic / VMEM than f32); weights as bf16 for
    # the MXU (biases / LN params stay f32).
    mask_i8 = (mask != 0).astype(jnp.int8)
    bf16 = lambda w: w.astype(jnp.bfloat16)

    def full2d(shape):
        return pl.BlockSpec(shape, lambda b: (0, 0))

    in_specs = [
        pl.BlockSpec((Bt, S, D), lambda b: (b, 0, 0)),   # x
        pl.BlockSpec((Bt, S, S), lambda b: (b, 0, 0)),   # mask (int8)
        full2d((1, D)), full2d((1, D)),                  # ln0 a, b
        full2d((D, D)), full2d((1, D)),                  # wq, bq
        full2d((D, D)), full2d((1, D)),                  # wk, bk
        full2d((D, D)), full2d((1, D)),                  # wv, bv
        full2d((D, D)), full2d((1, D)),                  # wo, bo
        full2d((1, D)), full2d((1, D)),                  # ln1 a, b
        full2d((D, F)), full2d((1, F)),                  # w1, b1
        full2d((F, D)), full2d((1, D)),                  # w2, b2
    ]

    kernel = functools.partial(_transformer_block_kernel, n_heads=n_heads, eps=eps)
    return pl.pallas_call(
        kernel,
        out_shape=jax.ShapeDtypeStruct((B, S, D), x.dtype),
        grid_spec=pltpu.PrefetchScalarGridSpec(
            num_scalar_prefetch=0,
            grid=(B // Bt,),
            in_specs=in_specs,
            out_specs=pl.BlockSpec((Bt, S, D), lambda b: (b, 0, 0)),
        ),
        compiler_params=pltpu.CompilerParams(
            dimension_semantics=("parallel",),            # batch tiles independent
            vmem_limit_bytes=48 * 1024 * 1024),
    )(x, mask_i8,
      params["ln0_a"], params["ln0_b"],
      bf16(params["wq"]), params["bq"], bf16(params["wk"]), params["bk"],
      bf16(params["wv"]), params["bv"], bf16(params["wo"]), params["bo"],
      params["ln1_a"], params["ln1_b"],
      bf16(params["w1"]), params["b1"], bf16(params["w2"]), params["b2"])


def reference_transformer_block(x, mask, p, *, n_heads, eps=1e-6):
    """Pure-JAX f32 reference with identical math (for correctness check)."""
    B, S, D = x.shape
    Dh = D // n_heads
    hp = jax.lax.Precision.HIGHEST

    def ln(y, a, b):
        mean = jnp.mean(y, -1, keepdims=True)
        var = jnp.sum((y - mean) ** 2, -1, keepdims=True) / (y.shape[-1] - 1)
        return a * (y - mean) / (jnp.sqrt(var) + eps) + b

    h = ln(x, p["ln0_a"], p["ln0_b"])
    q = jnp.einsum("bsd,de->bse", h, p["wq"], precision=hp) + p["bq"]
    k = jnp.einsum("bsd,de->bse", h, p["wk"], precision=hp) + p["bk"]
    v = jnp.einsum("bsd,de->bse", h, p["wv"], precision=hp) + p["bv"]
    qh = q.reshape(B, S, n_heads, Dh).transpose(0, 2, 1, 3)
    kh = k.reshape(B, S, n_heads, Dh).transpose(0, 2, 1, 3)
    vh = v.reshape(B, S, n_heads, Dh).transpose(0, 2, 1, 3)
    s = jnp.einsum("bhqd,bhkd->bhqk", qh, kh, precision=hp) / math.sqrt(Dh)
    s = jnp.where(mask[:, None, :, :] == 0, -1e9, s)
    s = s - jnp.max(s, -1, keepdims=True)
    pr = jnp.exp(s)
    pr = pr / jnp.sum(pr, -1, keepdims=True)
    o = jnp.einsum("bhqk,bhkd->bhqd", pr, vh, precision=hp)
    o = o.transpose(0, 2, 1, 3).reshape(B, S, D)
    attn = jnp.einsum("bsd,de->bse", o, p["wo"], precision=hp) + p["bo"]
    x1 = x + attn
    h2 = ln(x1, p["ln1_a"], p["ln1_b"])
    hid = jnp.maximum(jnp.einsum("bsd,df->bsf", h2, p["w1"], precision=hp) + p["b1"], 0.0)
    ff = jnp.einsum("bsf,fd->bsd", hid, p["w2"], precision=hp) + p["b2"]
    return x1 + ff


if __name__ == "__main__":
    # Small shapes consistent with the module: batch=2, seq=8, d_model=32,
    # heads=4, d_ff=64.
    B, S, D, H, F = 2, 8, 32, 4, 64
    key = jax.random.PRNGKey(0)
    ks = jax.random.split(key, 16)

    def dense_init(k, fan_in, shape):
        # ~ PyTorch nn.Linear default init: U(-1/sqrt(fan_in), 1/sqrt(fan_in))
        lim = 1.0 / math.sqrt(fan_in)
        return jax.random.uniform(k, shape, jnp.float32, -lim, lim)

    params = {
        "ln0_a": 1.0 + 0.1 * jax.random.normal(ks[12], (1, D), jnp.float32),
        "ln0_b": 0.1 * jax.random.normal(ks[13], (1, D), jnp.float32),
        "ln1_a": 1.0 + 0.1 * jax.random.normal(ks[14], (1, D), jnp.float32),
        "ln1_b": 0.1 * jax.random.normal(ks[15], (1, D), jnp.float32),
        "wq": dense_init(ks[0], D, (D, D)), "bq": dense_init(ks[1], D, (1, D)),
        "wk": dense_init(ks[2], D, (D, D)), "bk": dense_init(ks[3], D, (1, D)),
        "wv": dense_init(ks[4], D, (D, D)), "bv": dense_init(ks[5], D, (1, D)),
        "wo": dense_init(ks[6], D, (D, D)), "bo": dense_init(ks[7], D, (1, D)),
        "w1": dense_init(ks[8], D, (D, F)), "b1": dense_init(ks[9], D, (1, F)),
        "w2": dense_init(ks[10], F, (F, D)), "b2": dense_init(ks[11], F, (1, D)),
    }

    x = jax.random.normal(jax.random.fold_in(key, 123), (B, S, D), jnp.float32)
    # Causal ("subsequent positions") mask: 1 = attend, 0 = masked.
    causal = jnp.tril(jnp.ones((S, S), jnp.float32))
    mask = jnp.broadcast_to(causal, (B, S, S))

    out = transformer_block(x, mask, params, n_heads=H)
    out = jax.block_until_ready(out)

    ref = reference_transformer_block(x, mask, params, n_heads=H)
    assert out.shape == (B, S, D)
    # Tolerance loosened vs the pure-f32 version: MXU operands are bf16
    # (f32 accumulation) and softmax uses an approximate reciprocal.
    assert jnp.allclose(out, ref, atol=5e-2, rtol=5e-2), (
        "max abs diff = %r" % float(jnp.max(jnp.abs(out - ref))))

    print("KERNEL_OK")
</pallas_src>

<mosaic_0001>
module attributes {stable_mosaic.version = 11 : i64} {
  func.func @_transformer_block_kernel(%arg0: i32, %arg1: memref<2x8x32xf32, #tpu.memory_space<vmem>>, %arg2: memref<2x8x8xi8, #tpu.memory_space<vmem>>, %arg3: memref<1x32xf32, #tpu.memory_space<vmem>>, %arg4: memref<1x32xf32, #tpu.memory_space<vmem>>, %arg5: memref<32x32xbf16, #tpu.memory_space<vmem>>, %arg6: memref<1x32xf32, #tpu.memory_space<vmem>>, %arg7: memref<32x32xbf16, #tpu.memory_space<vmem>>, %arg8: memref<1x32xf32, #tpu.memory_space<vmem>>, %arg9: memref<32x32xbf16, #tpu.memory_space<vmem>>, %arg10: memref<1x32xf32, #tpu.memory_space<vmem>>, %arg11: memref<32x32xbf16, #tpu.memory_space<vmem>>, %arg12: memref<1x32xf32, #tpu.memory_space<vmem>>, %arg13: memref<1x32xf32, #tpu.memory_space<vmem>>, %arg14: memref<1x32xf32, #tpu.memory_space<vmem>>, %arg15: memref<32x64xbf16, #tpu.memory_space<vmem>>, %arg16: memref<1x64xf32, #tpu.memory_space<vmem>>, %arg17: memref<64x32xbf16, #tpu.memory_space<vmem>>, %arg18: memref<1x32xf32, #tpu.memory_space<vmem>>, %arg19: memref<2x8x32xf32, #tpu.memory_space<vmem>>) attributes {dimension_semantics = [#tpu.dimension_semantics<parallel>], iteration_bounds = array<i64: 1>, scalar_prefetch = 0 : i64, scratch_operands = 0 : i64, tpu.core_type = #tpu.core_type<tc>, window_params = [{transform_indices = @transform_0, window_bounds = array<i64: 2, 8, 32>}, {transform_indices = @transform_1, window_bounds = array<i64: 2, 8, 8>}, {pipeline_mode = #tpu.pipeline_mode<synchronous>, transform_indices = @transform_2, window_bounds = array<i64: 1, 32>}, {pipeline_mode = #tpu.pipeline_mode<synchronous>, transform_indices = @transform_3, window_bounds = array<i64: 1, 32>}, {pipeline_mode = #tpu.pipeline_mode<synchronous>, transform_indices = @transform_4, window_bounds = array<i64: 32, 32>}, {pipeline_mode = #tpu.pipeline_mode<synchronous>, transform_indices = @transform_5, window_bounds = array<i64: 1, 32>}, {pipeline_mode = #tpu.pipeline_mode<synchronous>, transform_indices = @transform_6, window_bounds = array<i64: 32, 32>}, {pipeline_mode = #tpu.pipeline_mode<synchronous>, transform_indices = @transform_7, window_bounds = array<i64: 1, 32>}, {pipeline_mode = #tpu.pipeline_mode<synchronous>, transform_indices = @transform_8, window_bounds = array<i64: 32, 32>}, {pipeline_mode = #tpu.pipeline_mode<synchronous>, transform_indices = @transform_9, window_bounds = array<i64: 1, 32>}, {pipeline_mode = #tpu.pipeline_mode<synchronous>, transform_indices = @transform_10, window_bounds = array<i64: 32, 32>}, {pipeline_mode = #tpu.pipeline_mode<synchronous>, transform_indices = @transform_11, window_bounds = array<i64: 1, 32>}, {pipeline_mode = #tpu.pipeline_mode<synchronous>, transform_indices = @transform_12, window_bounds = array<i64: 1, 32>}, {pipeline_mode = #tpu.pipeline_mode<synchronous>, transform_indices = @transform_13, window_bounds = array<i64: 1, 32>}, {pipeline_mode = #tpu.pipeline_mode<synchronous>, transform_indices = @transform_14, window_bounds = array<i64: 32, 64>}, {pipeline_mode = #tpu.pipeline_mode<synchronous>, transform_indices = @transform_15, window_bounds = array<i64: 1, 64>}, {pipeline_mode = #tpu.pipeline_mode<synchronous>, transform_indices = @transform_16, window_bounds = array<i64: 64, 32>}, {pipeline_mode = #tpu.pipeline_mode<synchronous>, transform_indices = @transform_17, window_bounds = array<i64: 1, 32>}, {transform_indices = @transform_18, window_bounds = array<i64: 2, 8, 32>}]} {
    %c0 = arith.constant 0 : index
    %c0_0 = arith.constant 0 : index
    %c0_1 = arith.constant 0 : index
    %0 = vector.load %arg1[%c0, %c0_0, %c0_1] : memref<2x8x32xf32, #tpu.memory_space<vmem>>, vector<2x8x32xf32>
    %1 = vector.shape_cast %0 : vector<2x8x32xf32> to vector<16x32xf32>
    %c0_2 = arith.constant 0 : index
    %c0_3 = arith.constant 0 : index
    %c0_4 = arith.constant 0 : index
    %2 = vector.load %arg2[%c0_2, %c0_3, %c0_4] : memref<2x8x8xi8, #tpu.memory_space<vmem>>, vector<2x8x8xi8>
    %3 = arith.extsi %2 : vector<2x8x8xi8> to vector<2x8x8xi32>
    %c0_i32 = arith.constant 0 : i32
    %4 = vector.broadcast %c0_i32 : i32 to vector<2x8x8xi32>
    %5 = arith.cmpi eq, %3, %4 : vector<2x8x8xi32>
    %c0_5 = arith.constant 0 : index
    %c0_6 = arith.constant 0 : index
    %6 = vector.load %arg3[%c0_5, %c0_6] : memref<1x32xf32, #tpu.memory_space<vmem>>, vector<1x32xf32>
    %c0_7 = arith.constant 0 : index
    %c0_8 = arith.constant 0 : index
    %7 = vector.load %arg4[%c0_7, %c0_8] : memref<1x32xf32, #tpu.memory_space<vmem>>, vector<1x32xf32>
    %cst = arith.constant dense<0.000000e+00> : vector<16xf32>
    %8 = vector.multi_reduction <add>, %1, %cst [1] : vector<16x32xf32> to vector<16xf32>
    %9 = vector.shape_cast %8 : vector<16xf32> to vector<16x1xf32>
    %cst_9 = arith.constant 3.200000e+01 : f32
    %10 = vector.broadcast %cst_9 : f32 to vector<16x1xf32>
    %11 = arith.divf %9, %10 : vector<16x1xf32>
    %12 = vector.broadcast %11 : vector<16x1xf32> to vector<16x32xf32>
    %13 = arith.subf %1, %12 : vector<16x32xf32>
    %14 = arith.mulf %13, %13 : vector<16x32xf32>
    %cst_10 = arith.constant dense<0.000000e+00> : vector<16xf32>
    %15 = vector.multi_reduction <add>, %14, %cst_10 [1] : vector<16x32xf32> to vector<16xf32>
    %16 = vector.shape_cast %15 : vector<16xf32> to vector<16x1xf32>
    %cst_11 = arith.constant 3.100000e+01 : f32
    %17 = vector.broadcast %cst_11 : f32 to vector<16x1xf32>
    %18 = arith.divf %16, %17 : vector<16x1xf32>
    %19 = math.sqrt %18 : vector<16x1xf32>
    %20 = vector.broadcast %11 : vector<16x1xf32> to vector<16x32xf32>
    %21 = arith.subf %1, %20 : vector<16x32xf32>
    %22 = vector.broadcast %6 : vector<1x32xf32> to vector<16x32xf32>
    %23 = arith.mulf %22, %21 : vector<16x32xf32>
    %cst_12 = arith.constant 9.99999997E-7 : f32
    %24 = vector.broadcast %cst_12 : f32 to vector<16x1xf32>
    %25 = arith.addf %19, %24 : vector<16x1xf32>
    %26 = vector.broadcast %25 : vector<16x1xf32> to vector<16x32xf32>
    %27 = arith.divf %23, %26 : vector<16x32xf32>
    %28 = vector.broadcast %7 : vector<1x32xf32> to vector<16x32xf32>
    %29 = arith.addf %27, %28 : vector<16x32xf32>
    %30 = arith.truncf %29 : vector<16x32xf32> to vector<16x32xbf16>
    %c0_13 = arith.constant 0 : index
    %c0_14 = arith.constant 0 : index
    %31 = vector.load %arg5[%c0_13, %c0_14] : memref<32x32xbf16, #tpu.memory_space<vmem>>, vector<32x32xbf16>
    %cst_15 = arith.constant dense<0.000000e+00> : vector<16x32xf32>
    %32 = tpu.matmul %30, %31, %cst_15 {dimension_numbers = #tpu.dot_dimension_numbers<[1], [0], [0], [1], [0, 0, 1, 1], [], []>} : vector<16x32xbf16>, vector<32x32xbf16>, vector<16x32xf32> -> vector<16x32xf32>
    %c0_16 = arith.constant 0 : index
    %c0_17 = arith.constant 0 : index
    %33 = vector.load %arg6[%c0_16, %c0_17] : memref<1x32xf32, #tpu.memory_space<vmem>>, vector<1x32xf32>
    %34 = vector.broadcast %33 : vector<1x32xf32> to vector<16x32xf32>
    %35 = arith.addf %32, %34 : vector<16x32xf32>
    %c0_18 = arith.constant 0 : index
    %c0_19 = arith.constant 0 : index
    %36 = vector.load %arg7[%c0_18, %c0_19] : memref<32x32xbf16, #tpu.memory_space<vmem>>, vector<32x32xbf16>
    %cst_20 = arith.constant dense<0.000000e+00> : vector<16x32xf32>
    %37 = tpu.matmul %30, %36, %cst_20 {dimension_numbers = #tpu.dot_dimension_numbers<[1], [0], [0], [1], [0, 0, 1, 1], [], []>} : vector<16x32xbf16>, vector<32x32xbf16>, vector<16x32xf32> -> vector<16x32xf32>
    %c0_21 = arith.constant 0 : index
    %c0_22 = arith.constant 0 : index
    %38 = vector.load %arg8[%c0_21, %c0_22] : memref<1x32xf32, #tpu.memory_space<vmem>>, vector<1x32xf32>
    %39 = vector.broadcast %38 : vector<1x32xf32> to vector<16x32xf32>
    %40 = arith.addf %37, %39 : vector<16x32xf32>
    %c0_23 = arith.constant 0 : index
    %c0_24 = arith.constant 0 : index
    %41 = vector.load %arg9[%c0_23, %c0_24] : memref<32x32xbf16, #tpu.memory_space<vmem>>, vector<32x32xbf16>
    %cst_25 = arith.constant dense<0.000000e+00> : vector<16x32xf32>
    %42 = tpu.matmul %30, %41, %cst_25 {dimension_numbers = #tpu.dot_dimension_numbers<[1], [0], [0], [1], [0, 0, 1, 1], [], []>} : vector<16x32xbf16>, vector<32x32xbf16>, vector<16x32xf32> -> vector<16x32xf32>
    %c0_26 = arith.constant 0 : index
    %c0_27 = arith.constant 0 : index
    %43 = vector.load %arg10[%c0_26, %c0_27] : memref<1x32xf32, #tpu.memory_space<vmem>>, vector<1x32xf32>
    %44 = vector.broadcast %43 : vector<1x32xf32> to vector<16x32xf32>
    %45 = arith.addf %42, %44 : vector<16x32xf32>
    %46 = arith.truncf %35 : vector<16x32xf32> to vector<16x32xbf16>
    %47 = arith.truncf %40 : vector<16x32xf32> to vector<16x32xbf16>
    %48 = arith.truncf %45 : vector<16x32xf32> to vector<16x32xbf16>
    %c0_28 = arith.constant 0 : index
    %c0_29 = arith.constant 0 : index
    %49 = vector.load %arg11[%c0_28, %c0_29] : memref<32x32xbf16, #tpu.memory_space<vmem>>, vector<32x32xbf16>
    %cst_30 = arith.constant 0.000000e+00 : f32
    %50 = vector.broadcast %cst_30 : f32 to vector<16x32xf32>
    %51 = vector.extract_strided_slice %46 {offsets = [0, 0], sizes = [16, 8], strides = [1, 1]} : vector<16x32xbf16> to vector<16x8xbf16>
    %52 = vector.shape_cast %51 : vector<16x8xbf16> to vector<2x8x8xbf16>
    %53 = vector.extract_strided_slice %47 {offsets = [0, 0], sizes = [16, 8], strides = [1, 1]} : vector<16x32xbf16> to vector<16x8xbf16>
    %54 = vector.shape_cast %53 : vector<16x8xbf16> to vector<2x8x8xbf16>
    %55 = vector.extract_strided_slice %48 {offsets = [0, 0], sizes = [16, 8], strides = [1, 1]} : vector<16x32xbf16> to vector<16x8xbf16>
    %56 = vector.shape_cast %55 : vector<16x8xbf16> to vector<2x8x8xbf16>
    "tpu.trace_start"() <{level = 10 : i32, message = "bqd,bkd->bqk"}> : () -> ()
    %cst_31 = arith.constant dense<0.000000e+00> : vector<2x8x8xf32>
    %57 = tpu.matmul %52, %54, %cst_31 {dimension_numbers = #tpu.dot_dimension_numbers<[2], [2], [1], [1], [0, 0, 0, 1, 1, 1], [0], [0]>} : vector<2x8x8xbf16>, vector<2x8x8xbf16>, vector<2x8x8xf32> -> vector<2x8x8xf32>
    "tpu.trace_stop"() : () -> ()
    %cst_32 = arith.constant 0.353553385 : f32
    %58 = vector.broadcast %cst_32 : f32 to vector<2x8x8xf32>
    %59 = arith.mulf %57, %58 : vector<2x8x8xf32>
    %cst_33 = arith.constant -1.000000e+09 : f32
    %60 = vector.broadcast %cst_33 : f32 to vector<2x8x8xf32>
    %61 = arith.select %5, %60, %59 : vector<2x8x8xi1>, vector<2x8x8xf32>
    %cst_34 = arith.constant dense<0xFF800000> : vector<2x8xf32>
    %62 = vector.multi_reduction <maximumf>, %61, %cst_34 [2] : vector<2x8x8xf32> to vector<2x8xf32>
    %63 = vector.shape_cast %62 : vector<2x8xf32> to vector<2x8x1xf32>
    %64 = vector.broadcast %63 : vector<2x8x1xf32> to vector<2x8x8xf32>
    %65 = arith.subf %61, %64 : vector<2x8x8xf32>
    %66 = math.exp %65 : vector<2x8x8xf32>
    %cst_35 = arith.constant dense<0.000000e+00> : vector<2x8xf32>
    %67 = vector.multi_reduction <add>, %66, %cst_35 [2] : vector<2x8x8xf32> to vector<2x8xf32>
    %68 = vector.shape_cast %67 : vector<2x8xf32> to vector<2x8x1xf32>
    %69 = tpu.reciprocal %68 {approx = true} : vector<2x8x1xf32> -> vector<2x8x1xf32>
    %70 = vector.broadcast %69 : vector<2x8x1xf32> to vector<2x8x8xf32>
    %71 = arith.mulf %66, %70 : vector<2x8x8xf32>
    %72 = arith.truncf %71 : vector<2x8x8xf32> to vector<2x8x8xbf16>
    "tpu.trace_start"() <{level = 10 : i32, message = "bqk,bkd->bqd"}> : () -> ()
    %cst_36 = arith.constant dense<0.000000e+00> : vector<2x8x8xf32>
    %73 = tpu.matmul %72, %56, %cst_36 {dimension_numbers = #tpu.dot_dimension_numbers<[2], [1], [1], [2], [0, 0, 0, 1, 1, 2], [0], [0]>} : vector<2x8x8xbf16>, vector<2x8x8xbf16>, vector<2x8x8xf32> -> vector<2x8x8xf32>
    "tpu.trace_stop"() : () -> ()
    %74 = vector.shape_cast %73 : vector<2x8x8xf32> to vector<16x8xf32>
    %75 = arith.truncf %74 : vector<16x8xf32> to vector<16x8xbf16>
    %76 = vector.extract_strided_slice %49 {offsets = [0, 0], sizes = [8, 32], strides = [1, 1]} : vector<32x32xbf16> to vector<8x32xbf16>
    %cst_37 = arith.constant dense<0.000000e+00> : vector<16x32xf32>
    %77 = tpu.matmul %75, %76, %cst_37 {dimension_numbers = #tpu.dot_dimension_numbers<[1], [0], [0], [1], [0, 0, 1, 1], [], []>} : vector<16x8xbf16>, vector<8x32xbf16>, vector<16x32xf32> -> vector<16x32xf32>
    %78 = arith.addf %50, %77 : vector<16x32xf32>
    %79 = vector.extract_strided_slice %46 {offsets = [0, 8], sizes = [16, 8], strides = [1, 1]} : vector<16x32xbf16> to vector<16x8xbf16>
    %80 = vector.shape_cast %79 : vector<16x8xbf16> to vector<2x8x8xbf16>
    %81 = vector.extract_strided_slice %47 {offsets = [0, 8], sizes = [16, 8], strides = [1, 1]} : vector<16x32xbf16> to vector<16x8xbf16>
    %82 = vector.shape_cast %81 : vector<16x8xbf16> to vector<2x8x8xbf16>
    %83 = vector.extract_strided_slice %48 {offsets = [0, 8], sizes = [16, 8], strides = [1, 1]} : vector<16x32xbf16> to vector<16x8xbf16>
    %84 = vector.shape_cast %83 : vector<16x8xbf16> to vector<2x8x8xbf16>
    "tpu.trace_start"() <{level = 10 : i32, message = "bqd,bkd->bqk"}> : () -> ()
    %cst_38 = arith.constant dense<0.000000e+00> : vector<2x8x8xf32>
    %85 = tpu.matmul %80, %82, %cst_38 {dimension_numbers = #tpu.dot_dimension_numbers<[2], [2], [1], [1], [0, 0, 0, 1, 1, 1], [0], [0]>} : vector<2x8x8xbf16>, vector<2x8x8xbf16>, vector<2x8x8xf32> -> vector<2x8x8xf32>
    "tpu.trace_stop"() : () -> ()
    %cst_39 = arith.constant 0.353553385 : f32
    %86 = vector.broadcast %cst_39 : f32 to vector<2x8x8xf32>
    %87 = arith.mulf %85, %86 : vector<2x8x8xf32>
    %cst_40 = arith.constant -1.000000e+09 : f32
    %88 = vector.broadcast %cst_40 : f32 to vector<2x8x8xf32>
    %89 = arith.select %5, %88, %87 : vector<2x8x8xi1>, vector<2x8x8xf32>
    %cst_41 = arith.constant dense<0xFF800000> : vector<2x8xf32>
    %90 = vector.multi_reduction <maximumf>, %89, %cst_41 [2] : vector<2x8x8xf32> to vector<2x8xf32>
    %91 = vector.shape_cast %90 : vector<2x8xf32> to vector<2x8x1xf32>
    %92 = vector.broadcast %91 : vector<2x8x1xf32> to vector<2x8x8xf32>
    %93 = arith.subf %89, %92 : vector<2x8x8xf32>
    %94 = math.exp %93 : vector<2x8x8xf32>
    %cst_42 = arith.constant dense<0.000000e+00> : vector<2x8xf32>
    %95 = vector.multi_reduction <add>, %94, %cst_42 [2] : vector<2x8x8xf32> to vector<2x8xf32>
    %96 = vector.shape_cast %95 : vector<2x8xf32> to vector<2x8x1xf32>
    %97 = tpu.reciprocal %96 {approx = true} : vector<2x8x1xf32> -> vector<2x8x1xf32>
    %98 = vector.broadcast %97 : vector<2x8x1xf32> to vector<2x8x8xf32>
    %99 = arith.mulf %94, %98 : vector<2x8x8xf32>
    %100 = arith.truncf %99 : vector<2x8x8xf32> to vector<2x8x8xbf16>
    "tpu.trace_start"() <{level = 10 : i32, message = "bqk,bkd->bqd"}> : () -> ()
    %cst_43 = arith.constant dense<0.000000e+00> : vector<2x8x8xf32>
    %101 = tpu.matmul %100, %84, %cst_43 {dimension_numbers = #tpu.dot_dimension_numbers<[2], [1], [1], [2], [0, 0, 0, 1, 1, 2], [0], [0]>} : vector<2x8x8xbf16>, vector<2x8x8xbf16>, vector<2x8x8xf32> -> vector<2x8x8xf32>
    "tpu.trace_stop"() : () -> ()
    %102 = vector.shape_cast %101 : vector<2x8x8xf32> to vector<16x8xf32>
    %103 = arith.truncf %102 : vector<16x8xf32> to vector<16x8xbf16>
    %104 = vector.extract_strided_slice %49 {offsets = [8, 0], sizes = [8, 32], strides = [1, 1]} : vector<32x32xbf16> to vector<8x32xbf16>
    %cst_44 = arith.constant dense<0.000000e+00> : vector<16x32xf32>
    %105 = tpu.matmul %103, %104, %cst_44 {dimension_numbers = #tpu.dot_dimension_numbers<[1], [0], [0], [1], [0, 0, 1, 1], [], []>} : vector<16x8xbf16>, vector<8x32xbf16>, vector<16x32xf32> -> vector<16x32xf32>
    %106 = arith.addf %78, %105 : vector<16x32xf32>
    %107 = vector.extract_strided_slice %46 {offsets = [0, 16], sizes = [16, 8], strides = [1, 1]} : vector<16x32xbf16> to vector<16x8xbf16>
    %108 = vector.shape_cast %107 : vector<16x8xbf16> to vector<2x8x8xbf16>
    %109 = vector.extract_strided_slice %47 {offsets = [0, 16], sizes = [16, 8], strides = [1, 1]} : vector<16x32xbf16> to vector<16x8xbf16>
    %110 = vector.shape_cast %109 : vector<16x8xbf16> to vector<2x8x8xbf16>
    %111 = vector.extract_strided_slice %48 {offsets = [0, 16], sizes = [16, 8], strides = [1, 1]} : vector<16x32xbf16> to vector<16x8xbf16>
    %112 = vector.shape_cast %111 : vector<16x8xbf16> to vector<2x8x8xbf16>
    "tpu.trace_start"() <{level = 10 : i32, message = "bqd,bkd->bqk"}> : () -> ()
    %cst_45 = arith.constant dense<0.000000e+00> : vector<2x8x8xf32>
    %113 = tpu.matmul %108, %110, %cst_45 {dimension_numbers = #tpu.dot_dimension_numbers<[2], [2], [1], [1], [0, 0, 0, 1, 1, 1], [0], [0]>} : vector<2x8x8xbf16>, vector<2x8x8xbf16>, vector<2x8x8xf32> -> vector<2x8x8xf32>
    "tpu.trace_stop"() : () -> ()
    %cst_46 = arith.constant 0.353553385 : f32
    %114 = vector.broadcast %cst_46 : f32 to vector<2x8x8xf32>
    %115 = arith.mulf %113, %114 : vector<2x8x8xf32>
    %cst_47 = arith.constant -1.000000e+09 : f32
    %116 = vector.broadcast %cst_47 : f32 to vector<2x8x8xf32>
    %117 = arith.select %5, %116, %115 : vector<2x8x8xi1>, vector<2x8x8xf32>
    %cst_48 = arith.constant dense<0xFF800000> : vector<2x8xf32>
    %118 = vector.multi_reduction <maximumf>, %117, %cst_48 [2] : vector<2x8x8xf32> to vector<2x8xf32>
    %119 = vector.shape_cast %118 : vector<2x8xf32> to vector<2x8x1xf32>
    %120 = vector.broadcast %119 : vector<2x8x1xf32> to vector<2x8x8xf32>
    %121 = arith.subf %117, %120 : vector<2x8x8xf32>
    %122 = math.exp %121 : vector<2x8x8xf32>
    %cst_49 = arith.constant dense<0.000000e+00> : vector<2x8xf32>
    %123 = vector.multi_reduction <add>, %122, %cst_49 [2] : vector<2x8x8xf32> to vector<2x8xf32>
    %124 = vector.shape_cast %123 : vector<2x8xf32> to vector<2x8x1xf32>
    %125 = tpu.reciprocal %124 {approx = true} : vector<2x8x1xf32> -> vector<2x8x1xf32>
    %126 = vector.broadcast %125 : vector<2x8x1xf32> to vector<2x8x8xf32>
    %127 = arith.mulf %122, %126 : vector<2x8x8xf32>
    %128 = arith.truncf %127 : vector<2x8x8xf32> to vector<2x8x8xbf16>
    "tpu.trace_start"() <{level = 10 : i32, message = "bqk,bkd->bqd"}> : () -> ()
    %cst_50 = arith.constant dense<0.000000e+00> : vector<2x8x8xf32>
    %129 = tpu.matmul %128, %112, %cst_50 {dimension_numbers = #tpu.dot_dimension_numbers<[2], [1], [1], [2], [0, 0, 0, 1, 1, 2], [0], [0]>} : vector<2x8x8xbf16>, vector<2x8x8xbf16>, vector<2x8x8xf32> -> vector<2x8x8xf32>
    "tpu.trace_stop"() : () -> ()
    %130 = vector.shape_cast %129 : vector<2x8x8xf32> to vector<16x8xf32>
    %131 = arith.truncf %130 : vector<16x8xf32> to vector<16x8xbf16>
    %132 = vector.extract_strided_slice %49 {offsets = [16, 0], sizes = [8, 32], strides = [1, 1]} : vector<32x32xbf16> to vector<8x32xbf16>
    %cst_51 = arith.constant dense<0.000000e+00> : vector<16x32xf32>
    %133 = tpu.matmul %131, %132, %cst_51 {dimension_numbers = #tpu.dot_dimension_numbers<[1], [0], [0], [1], [0, 0, 1, 1], [], []>} : vector<16x8xbf16>, vector<8x32xbf16>, vector<16x32xf32> -> vector<16x32xf32>
    %134 = arith.addf %106, %133 : vector<16x32xf32>
    %135 = vector.extract_strided_slice %46 {offsets = [0, 24], sizes = [16, 8], strides = [1, 1]} : vector<16x32xbf16> to vector<16x8xbf16>
    %136 = vector.shape_cast %135 : vector<16x8xbf16> to vector<2x8x8xbf16>
    %137 = vector.extract_strided_slice %47 {offsets = [0, 24], sizes = [16, 8], strides = [1, 1]} : vector<16x32xbf16> to vector<16x8xbf16>
    %138 = vector.shape_cast %137 : vector<16x8xbf16> to vector<2x8x8xbf16>
    %139 = vector.extract_strided_slice %48 {offsets = [0, 24], sizes = [16, 8], strides = [1, 1]} : vector<16x32xbf16> to vector<16x8xbf16>
    %140 = vector.shape_cast %139 : vector<16x8xbf16> to vector<2x8x8xbf16>
    "tpu.trace_start"() <{level = 10 : i32, message = "bqd,bkd->bqk"}> : () -> ()
    %cst_52 = arith.constant dense<0.000000e+00> : vector<2x8x8xf32>
    %141 = tpu.matmul %136, %138, %cst_52 {dimension_numbers = #tpu.dot_dimension_numbers<[2], [2], [1], [1], [0, 0, 0, 1, 1, 1], [0], [0]>} : vector<2x8x8xbf16>, vector<2x8x8xbf16>, vector<2x8x8xf32> -> vector<2x8x8xf32>
    "tpu.trace_stop"() : () -> ()
    %cst_53 = arith.constant 0.353553385 : f32
    %142 = vector.broadcast %cst_53 : f32 to vector<2x8x8xf32>
    %143 = arith.mulf %141, %142 : vector<2x8x8xf32>
    %cst_54 = arith.constant -1.000000e+09 : f32
    %144 = vector.broadcast %cst_54 : f32 to vector<2x8x8xf32>
    %145 = arith.select %5, %144, %143 : vector<2x8x8xi1>, vector<2x8x8xf32>
    %cst_55 = arith.constant dense<0xFF800000> : vector<2x8xf32>
    %146 = vector.multi_reduction <maximumf>, %145, %cst_55 [2] : vector<2x8x8xf32> to vector<2x8xf32>
    %147 = vector.shape_cast %146 : vector<2x8xf32> to vector<2x8x1xf32>
    %148 = vector.broadcast %147 : vector<2x8x1xf32> to vector<2x8x8xf32>
    %149 = arith.subf %145, %148 : vector<2x8x8xf32>
    %150 = math.exp %149 : vector<2x8x8xf32>
    %cst_56 = arith.constant dense<0.000000e+00> : vector<2x8xf32>
    %151 = vector.multi_reduction <add>, %150, %cst_56 [2] : vector<2x8x8xf32> to vector<2x8xf32>
    %152 = vector.shape_cast %151 : vector<2x8xf32> to vector<2x8x1xf32>
    %153 = tpu.reciprocal %152 {approx = true} : vector<2x8x1xf32> -> vector<2x8x1xf32>
    %154 = vector.broadcast %153 : vector<2x8x1xf32> to vector<2x8x8xf32>
    %155 = arith.mulf %150, %154 : vector<2x8x8xf32>
    %156 = arith.truncf %155 : vector<2x8x8xf32> to vector<2x8x8xbf16>
    "tpu.trace_start"() <{level = 10 : i32, message = "bqk,bkd->bqd"}> : () -> ()
    %cst_57 = arith.constant dense<0.000000e+00> : vector<2x8x8xf32>
    %157 = tpu.matmul %156, %140, %cst_57 {dimension_numbers = #tpu.dot_dimension_numbers<[2], [1], [1], [2], [0, 0, 0, 1, 1, 2], [0], [0]>} : vector<2x8x8xbf16>, vector<2x8x8xbf16>, vector<2x8x8xf32> -> vector<2x8x8xf32>
    "tpu.trace_stop"() : () -> ()
    %158 = vector.shape_cast %157 : vector<2x8x8xf32> to vector<16x8xf32>
    %159 = arith.truncf %158 : vector<16x8xf32> to vector<16x8xbf16>
    %160 = vector.extract_strided_slice %49 {offsets = [24, 0], sizes = [8, 32], strides = [1, 1]} : vector<32x32xbf16> to vector<8x32xbf16>
    %cst_58 = arith.constant dense<0.000000e+00> : vector<16x32xf32>
    %161 = tpu.matmul %159, %160, %cst_58 {dimension_numbers = #tpu.dot_dimension_numbers<[1], [0], [0], [1], [0, 0, 1, 1], [], []>} : vector<16x8xbf16>, vector<8x32xbf16>, vector<16x32xf32> -> vector<16x32xf32>
    %162 = arith.addf %134, %161 : vector<16x32xf32>
    %163 = arith.addf %1, %162 : vector<16x32xf32>
    %c0_59 = arith.constant 0 : index
    %c0_60 = arith.constant 0 : index
    %164 = vector.load %arg12[%c0_59, %c0_60] : memref<1x32xf32, #tpu.memory_space<vmem>>, vector<1x32xf32>
    %165 = vector.broadcast %164 : vector<1x32xf32> to vector<16x32xf32>
    %166 = arith.addf %163, %165 : vector<16x32xf32>
    %c0_61 = arith.constant 0 : index
    %c0_62 = arith.constant 0 : index
    %167 = vector.load %arg13[%c0_61, %c0_62] : memref<1x32xf32, #tpu.memory_space<vmem>>, vector<1x32xf32>
    %c0_63 = arith.constant 0 : index
    %c0_64 = arith.constant 0 : index
    %168 = vector.load %arg14[%c0_63, %c0_64] : memref<1x32xf32, #tpu.memory_space<vmem>>, vector<1x32xf32>
    %cst_65 = arith.constant dense<0.000000e+00> : vector<16xf32>
    %169 = vector.multi_reduction <add>, %166, %cst_65 [1] : vector<16x32xf32> to vector<16xf32>
    %170 = vector.shape_cast %169 : vector<16xf32> to vector<16x1xf32>
    %cst_66 = arith.constant 3.200000e+01 : f32
    %171 = vector.broadcast %cst_66 : f32 to vector<16x1xf32>
    %172 = arith.divf %170, %171 : vector<16x1xf32>
    %173 = vector.broadcast %172 : vector<16x1xf32> to vector<16x32xf32>
    %174 = arith.subf %166, %173 : vector<16x32xf32>
    %175 = arith.mulf %174, %174 : vector<16x32xf32>
    %cst_67 = arith.constant dense<0.000000e+00> : vector<16xf32>
    %176 = vector.multi_reduction <add>, %175, %cst_67 [1] : vector<16x32xf32> to vector<16xf32>
    %177 = vector.shape_cast %176 : vector<16xf32> to vector<16x1xf32>
    %cst_68 = arith.constant 3.100000e+01 : f32
    %178 = vector.broadcast %cst_68 : f32 to vector<16x1xf32>
    %179 = arith.divf %177, %178 : vector<16x1xf32>
    %180 = math.sqrt %179 : vector<16x1xf32>
    %181 = vector.broadcast %172 : vector<16x1xf32> to vector<16x32xf32>
    %182 = arith.subf %166, %181 : vector<16x32xf32>
    %183 = vector.broadcast %167 : vector<1x32xf32> to vector<16x32xf32>
    %184 = arith.mulf %183, %182 : vector<16x32xf32>
    %cst_69 = arith.constant 9.99999997E-7 : f32
    %185 = vector.broadcast %cst_69 : f32 to vector<16x1xf32>
    %186 = arith.addf %180, %185 : vector<16x1xf32>
    %187 = vector.broadcast %186 : vector<16x1xf32> to vector<16x32xf32>
    %188 = arith.divf %184, %187 : vector<16x32xf32>
    %189 = vector.broadcast %168 : vector<1x32xf32> to vector<16x32xf32>
    %190 = arith.addf %188, %189 : vector<16x32xf32>
    %191 = arith.truncf %190 : vector<16x32xf32> to vector<16x32xbf16>
    %c0_70 = arith.constant 0 : index
    %c0_71 = arith.constant 0 : index
    %192 = vector.load %arg15[%c0_70, %c0_71] : memref<32x64xbf16, #tpu.memory_space<vmem>>, vector<32x64xbf16>
    %cst_72 = arith.constant dense<0.000000e+00> : vector<16x64xf32>
    %193 = tpu.matmul %191, %192, %cst_72 {dimension_numbers = #tpu.dot_dimension_numbers<[1], [0], [0], [1], [0, 0, 1, 1], [], []>} : vector<16x32xbf16>, vector<32x64xbf16>, vector<16x64xf32> -> vector<16x64xf32>
    %c0_73 = arith.constant 0 : index
    %c0_74 = arith.constant 0 : index
    %194 = vector.load %arg16[%c0_73, %c0_74] : memref<1x64xf32, #tpu.memory_space<vmem>>, vector<1x64xf32>
    %195 = vector.broadcast %194 : vector<1x64xf32> to vector<16x64xf32>
    %196 = arith.addf %193, %195 : vector<16x64xf32>
    %cst_75 = arith.constant 0.000000e+00 : f32
    %197 = vector.broadcast %cst_75 : f32 to vector<16x64xf32>
    %198 = arith.maximumf %196, %197 : vector<16x64xf32>
    %199 = arith.truncf %198 : vector<16x64xf32> to vector<16x64xbf16>
    %c0_76 = arith.constant 0 : index
    %c0_77 = arith.constant 0 : index
    %200 = vector.load %arg17[%c0_76, %c0_77] : memref<64x32xbf16, #tpu.memory_space<vmem>>, vector<64x32xbf16>
    %cst_78 = arith.constant dense<0.000000e+00> : vector<16x32xf32>
    %201 = tpu.matmul %199, %200, %cst_78 {dimension_numbers = #tpu.dot_dimension_numbers<[1], [0], [0], [1], [0, 0, 1, 1], [], []>} : vector<16x64xbf16>, vector<64x32xbf16>, vector<16x32xf32> -> vector<16x32xf32>
    %c0_79 = arith.constant 0 : index
    %c0_80 = arith.constant 0 : index
    %202 = vector.load %arg18[%c0_79, %c0_80] : memref<1x32xf32, #tpu.memory_space<vmem>>, vector<1x32xf32>
    %203 = vector.broadcast %202 : vector<1x32xf32> to vector<16x32xf32>
    %204 = arith.addf %201, %203 : vector<16x32xf32>
    %205 = arith.addf %166, %204 : vector<16x32xf32>
    %206 = vector.shape_cast %205 : vector<16x32xf32> to vector<2x8x32xf32>
    %c0_81 = arith.constant 0 : index
    %c0_82 = arith.constant 0 : index
    %c0_83 = arith.constant 0 : index
    %207 = vector.load %arg19[%c0_81, %c0_82, %c0_83] : memref<2x8x32xf32, #tpu.memory_space<vmem>>, vector<2x8x32xf32>
    tpu.vector_store %arg19[%c0_81, %c0_82, %c0_83], %206 {strides = array<i32>} : memref<2x8x32xf32, #tpu.memory_space<vmem>>, vector<2x8x32xf32>,
    return
  }
  func.func @transform_0(%arg0: i32) -> (i32, i32, i32) {
    %c0_i32 = arith.constant 0 : i32
    %c0_i32_0 = arith.constant 0 : i32
    %c0_i32_1 = arith.constant 0 : i32
    return %arg0, %c0_i32, %c0_i32_0 : i32, i32, i32
  }
  func.func @transform_1(%arg0: i32) -> (i32, i32, i32) {
    %c0_i32 = arith.constant 0 : i32
    %c0_i32_0 = arith.constant 0 : i32
    %c0_i32_1 = arith.constant 0 : i32
    return %arg0, %c0_i32, %c0_i32_0 : i32, i32, i32
  }
  func.func @transform_2(%arg0: i32) -> (i32, i32) {
    %c0_i32 = arith.constant 0 : i32
    %c0_i32_0 = arith.constant 0 : i32
    %c0_i32_1 = arith.constant 0 : i32
    return %c0_i32, %c0_i32_0 : i32, i32
  }
  func.func @transform_3(%arg0: i32) -> (i32, i32) {
    %c0_i32 = arith.constant 0 : i32
    %c0_i32_0 = arith.constant 0 : i32
    %c0_i32_1 = arith.constant 0 : i32
    return %c0_i32, %c0_i32_0 : i32, i32
  }
  func.func @transform_4(%arg0: i32) -> (i32, i32) {
    %c0_i32 = arith.constant 0 : i32
    %c0_i32_0 = arith.constant 0 : i32
    %c0_i32_1 = arith.constant 0 : i32
    return %c0_i32, %c0_i32_0 : i32, i32
  }
  func.func @transform_5(%arg0: i32) -> (i32, i32) {
    %c0_i32 = arith.constant 0 : i32
    %c0_i32_0 = arith.constant 0 : i32
    %c0_i32_1 = arith.constant 0 : i32
    return %c0_i32, %c0_i32_0 : i32, i32
  }
  func.func @transform_6(%arg0: i32) -> (i32, i32) {
    %c0_i32 = arith.constant 0 : i32
    %c0_i32_0 = arith.constant 0 : i32
    %c0_i32_1 = arith.constant 0 : i32
    return %c0_i32, %c0_i32_0 : i32, i32
  }
  func.func @transform_7(%arg0: i32) -> (i32, i32) {
    %c0_i32 = arith.constant 0 : i32
    %c0_i32_0 = arith.constant 0 : i32
    %c0_i32_1 = arith.constant 0 : i32
    return %c0_i32, %c0_i32_0 : i32, i32
  }
  func.func @transform_8(%arg0: i32) -> (i32, i32) {
    %c0_i32 = arith.constant 0 : i32
    %c0_i32_0 = arith.constant 0 : i32
    %c0_i32_1 = arith.constant 0 : i32
    return %c0_i32, %c0_i32_0 : i32, i32
  }
  func.func @transform_9(%arg0: i32) -> (i32, i32) {
    %c0_i32 = arith.constant 0 : i32
    %c0_i32_0 = arith.constant 0 : i32
    %c0_i32_1 = arith.constant 0 : i32
    return %c0_i32, %c0_i32_0 : i32, i32
  }
  func.func @transform_10(%arg0: i32) -> (i32, i32) {
    %c0_i32 = arith.constant 0 : i32
    %c0_i32_0 = arith.constant 0 : i32
    %c0_i32_1 = arith.constant 0 : i32
    return %c0_i32, %c0_i32_0 : i32, i32
  }
  func.func @transform_11(%arg0: i32) -> (i32, i32) {
    %c0_i32 = arith.constant 0 : i32
    %c0_i32_0 = arith.constant 0 : i32
    %c0_i32_1 = arith.constant 0 : i32
    return %c0_i32, %c0_i32_0 : i32, i32
  }
  func.func @transform_12(%arg0: i32) -> (i32, i32) {
    %c0_i32 = arith.constant 0 : i32
    %c0_i32_0 = arith.constant 0 : i32
    %c0_i32_1 = arith.constant 0 : i32
    return %c0_i32, %c0_i32_0 : i32, i32
  }
  func.func @transform_13(%arg0: i32) -> (i32, i32) {
    %c0_i32 = arith.constant 0 : i32
    %c0_i32_0 = arith.constant 0 : i32
    %c0_i32_1 = arith.constant 0 : i32
    return %c0_i32, %c0_i32_0 : i32, i32
  }
  func.func @transform_14(%arg0: i32) -> (i32, i32) {
    %c0_i32 = arith.constant 0 : i32
    %c0_i32_0 = arith.constant 0 : i32
    %c0_i32_1 = arith.constant 0 : i32
    return %c0_i32, %c0_i32_0 : i32, i32
  }
  func.func @transform_15(%arg0: i32) -> (i32, i32) {
    %c0_i32 = arith.constant 0 : i32
    %c0_i32_0 = arith.constant 0 : i32
    %c0_i32_1 = arith.constant 0 : i32
    return %c0_i32, %c0_i32_0 : i32, i32
  }
  func.func @transform_16(%arg0: i32) -> (i32, i32) {
    %c0_i32 = arith.constant 0 : i32
    %c0_i32_0 = arith.constant 0 : i32
    %c0_i32_1 = arith.constant 0 : i32
    return %c0_i32, %c0_i32_0 : i32, i32
  }
  func.func @transform_17(%arg0: i32) -> (i32, i32) {
    %c0_i32 = arith.constant 0 : i32
    %c0_i32_0 = arith.constant 0 : i32
    %c0_i32_1 = arith.constant 0 : i32
    return %c0_i32, %c0_i32_0 : i32, i32
  }
  func.func @transform_18(%arg0: i32) -> (i32, i32, i32) {
    %c0_i32 = arith.constant 0 : i32
    %c0_i32_0 = arith.constant 0 : i32
    %c0_i32_1 = arith.constant 0 : i32
    return %arg0, %c0_i32, %c0_i32_0 : i32, i32, i32
  }
}

</mosaic_0001>

<bundles_post_ra>
// kernel: tpu_custom_call.1
= control target key start
LH: loop header
LB: loop body
LE: loop exit
PB: predicated region body
PF: predicated region fallthrough
CT: control target
= control target key end

     0   :  { %s2813_s0 = inlined_call_operand.vmem [shape: f32[2,8,32], index: 0, kind: input, shape index: {}]   ;;  %s2814_s1 = inlined_call_operand.hbm [shape: s8[2,8,8], index: 1, kind: input, shape index: {}]   ;;  %s2815_s2 = inlined_call_operand.hbm [shape: f32[1,32], index: 2, kind: input, shape index: {}]   ;;  %s2816_s3 = inlined_call_operand.hbm [shape: f32[1,32], index: 3, kind: input, shape index: {}]   ;;  %s2817_s4 = inlined_call_operand.vmem [shape: bf16[32,32], index: 4, kind: input, shape index: {}]   ;;  %s2818_s5 = inlined_call_operand.hbm [shape: f32[1,32], index: 5, kind: input, shape index: {}]   ;;  %s2819_s6 = inlined_call_operand.vmem [shape: bf16[32,32], index: 6, kind: input, shape index: {}]   ;;  %s2820_s7 = inlined_call_operand.hbm [shape: f32[1,32], index: 7, kind: input, shape index: {}]   ;;  %s2821_s8 = inlined_call_operand.hbm [shape: bf16[32,32], index: 8, kind: input, shape index: {}]   ;;  %s2822_s9 = inlined_call_operand.hbm [shape: f32[1,32], index: 9, kind: input, shape index: {}]   ;;  %s2823_s10 = inlined_call_operand.vmem [shape: bf16[32,32], index: 10, kind: input, shape index: {}]   ;;  %s2824_s11 = inlined_call_operand.vmem [shape: f32[1,32], index: 11, kind: input, shape index: {}]   ;;  %s2825_s12 = inlined_call_operand.vmem [shape: f32[1,32], index: 12, kind: input, shape index: {}]   ;;  %s2826_s13 = inlined_call_operand.vmem [shape: f32[1,32], index: 13, kind: input, shape index: {}]   ;;  %s2827_s14 = inlined_call_operand.hbm [shape: bf16[32,64], index: 14, kind: input, shape index: {}]   ;;  %s2828_s15 = inlined_call_operand.vmem [shape: f32[1,64], index: 15, kind: input, shape index: {}]   ;;  %s2829_s16 = inlined_call_operand.vmem [shape: bf16[64,32], index: 16, kind: input, shape index: {}]   ;;  %s2830_s17 = inlined_call_operand.vmem [shape: f32[1,32], index: 17, kind: input, shape index: {}]   ;;  %s2831_s18 = inlined_call_operand.hbm [shape: f32[2,8,32], index: 18, kind: output, shape index: {}]  }
   0x1   :  { %2833 = sst [smem:[#allocation23_spill]] %s2813_s0 }
   0x2   :  { %2834 = sst [smem:[#allocation24_spill]] %s2814_s1 }
   0x3   :  { %2835 = sst [smem:[#allocation25_spill]] %s2815_s2 }
   0x4   :  { %23 = vsyncpa [#allocation3], 0 }
   0x5   :  { %24 = vsyncpa [#allocation6], 0 }
   0x6   :  { %25 = vsyncpa [#allocation9], 0 }
   0x7   :  { %26 = vsyncpa [#allocation12], 0 }
   0x8   :  { %27 = vsyncpa [#allocation15], 0 }
   0x9   :  { %28 = vsyncpa [#allocation4], 0  ;;  %s2334_s27 = smov [#allocation5]   ;;  %s2335_s29 = smov [#allocation8]  }
   0xa   :  { %s49_s28 = sshll.u32 %s2334_s27, 4  ;;  %s71_s30 = sshll.u32 %s2335_s29, 4  ;;  %s50_s28 = int_to_ptr.vmem [resolvable:$true] %s49_s28  ;;  %s72_s30 = int_to_ptr.vmem [resolvable:$true] %s71_s30 }
   0xb   :  { %s2150_s0 = scalar_lea.vmem %s50_s28, 16  ;;  %s2154_s19 = scalar_lea.vmem %s50_s28, 32 }
   0xc   :  { %p2151_p0 = scmp.ne.s32.totalorder %s50_s28, %s2150_s0  ;;  %p2155_p1 = scmp.lt.s32.totalorder %s50_s28, %s50_s28 }
   0xd   :  { %p2156_p2 = scmp.lt.s32.totalorder %s2154_s19, %s2150_s0 }
   0xf   :  { %p2157_p3 = por %p2156_p2, %p2155_p1 }
  0x11   :  { %p2158_p4 = pnand %p2157_p3, %p2151_p0 }
  0x13   :  { %2161 = shalt.err (!%p2158_p4)
}
  0x14   :  { %s2836_s21 = sld [smem:[#allocation25_spill]]  ;;  %s2170_s22 = scalar_lea.vmem %s72_s30, 16 }
  0x15   :  { %p2171_p5 = scmp.ne.s32.totalorder %s72_s30, %s2170_s22  ;;  %s2174_s2 = scalar_lea.vmem %s72_s30, 32 }
  0x16   :  { %p2175_p6 = scmp.lt.s32.totalorder %s72_s30, %s72_s30  ;;  %p2176_p7 = scmp.lt.s32.totalorder %s2174_s2, %s2170_s22 }
  0x18   :  { %p2177_p8 = por %p2176_p7, %p2175_p6 }
  0x1a   :  { %52 = dma.hbm_to_vmem [thread:$0]  %s2836_s21, 16, %s50_s28, [#allocation6]  }
  0x1b   :  { %p2178_p9 = pnand %p2177_p8, %p2171_p5 }
  0x1d   :  { %2181 = shalt.err (!%p2178_p9)
}
  0x1e   :  { %74 = dma.hbm_to_vmem [thread:$0]  %s2818_s5, 16, %s72_s30, [#allocation9]  }
  0x1f   :  { %s2336_s25 = smov [#allocation11]  }
  0x20   :  { %s92_s26 = sshll.u32 %s2336_s25, 4  ;;  %s93_s26 = int_to_ptr.vmem [resolvable:$true] %s92_s26 }
  0x21   :  { %s2190_s27 = scalar_lea.vmem %s93_s26, 256  ;;  %p2195_p11 = scmp.lt.s32.totalorder %s93_s26, %s93_s26 }
  0x22   :  { %p2191_p10 = scmp.ne.s32.totalorder %s93_s26, %s2190_s27  ;;  %p2196_p12 = scmp.lt.s32.totalorder %s2190_s27, %s2190_s27 }
  0x24   :  { %p2197_p13 = por %p2196_p12, %p2195_p11 }
  0x26   :  { %p2198_p0 = pnand %p2197_p13, %p2191_p10 }
  0x28   :  { %2201 = shalt.err (!%p2198_p0)
}
  0x29   :  { %s2337_s28 = smov 64   ;;  %s2338_s29 = smov 4  }
  0x2a   :  { %98 = dma.hbm_to_vmem [thread:$0]  %s2821_s8, 256, %s93_s26, [#allocation12], %s2337_s28, %s2337_s28, %s2338_s29  }
  0x2b   :  { %s2339_s5 = smov [#allocation2]  }
  0x2c   :  { %s36_s30 = sshll.u32 %s2339_s5, 4  ;;  %s37_s30 = int_to_ptr.vmem [resolvable:$true] %s36_s30 }
  0x2d   :  { %s2210_s1 = scalar_lea.vmem %s37_s30, 64  ;;  %p2215_p2 = scmp.lt.s32.totalorder %s37_s30, %s37_s30 }
  0x2e   :  { %p2211_p1 = scmp.ne.s32.totalorder %s37_s30, %s2210_s1  ;;  %p2216_p3 = scmp.lt.s32.totalorder %s2210_s1, %s2210_s1 }
  0x30   :  { %p2217_p4 = por %p2216_p3, %p2215_p2 }
  0x32   :  { %p2218_p5 = pnand %p2217_p4, %p2211_p1 }
  0x34   :  { %2221 = shalt.err (!%p2218_p5)
}
  0x35   :  { %s2340_s20 = smov 32   ;;  %s2341_s21 = smov 2  }
  0x36   :  { %s2837_s23 = sld [smem:[#allocation24_spill]]  ;;  %s2342_s24 = smov [#allocation7]  }
  0x37   :  { %s59_s25 = sshll.u32 %s2342_s24, 4  ;;  %s2343_s27 = smov [#allocation10]   ;;  %s60_s25 = int_to_ptr.vmem [resolvable:$true] %s59_s25 }
  0x38   :  { %s83_s8 = sshll.u32 %s2343_s27, 4  ;;  %s2230_s26 = scalar_lea.vmem %s60_s25, 16  ;;  %s84_s8 = int_to_ptr.vmem [resolvable:$true] %s83_s8 }
  0x39   :  { %p2231_p6 = scmp.ne.s32.totalorder %s60_s25, %s2230_s26  ;;  %s2234_s0 = scalar_lea.vmem %s60_s25, 32 }
  0x3a   :  { %p2235_p7 = scmp.lt.s32.totalorder %s60_s25, %s60_s25  ;;  %p2236_p8 = scmp.lt.s32.totalorder %s2234_s0, %s2230_s26 }
  0x3c   :  { %42 = dma.hbm_to_vmem [thread:$0]  %s2837_s23, 64, %s37_s30, [#allocation3], %s2340_s20, %s2340_s20, %s2341_s21  }
  0x3d   :  { %p2237_p9 = por %p2236_p8, %p2235_p7 }
  0x3f   :  { %p2238_p10 = pnand %p2237_p9, %p2231_p6 }
  0x41   :  { %2241 = shalt.err (!%p2238_p10)
}
  0x42   :  { %62 = dma.hbm_to_vmem [thread:$0]  %s2816_s3, 16, %s60_s25, [#allocation6]  }
  0x43   :  { %s2250_s1 = scalar_lea.vmem %s84_s8, 16  ;;  %s2254_s30 = scalar_lea.vmem %s84_s8, 32 }
  0x44   :  { %p2251_p11 = scmp.ne.s32.totalorder %s84_s8, %s2250_s1  ;;  %p2255_p12 = scmp.lt.s32.totalorder %s84_s8, %s84_s8 }
  0x45   :  { %p2256_p13 = scmp.lt.s32.totalorder %s2254_s30, %s2250_s1 }
  0x47   :  { %p2257_p0 = por %p2256_p13, %p2255_p12 }
  0x49   :  { %p2258_p1 = pnand %p2257_p0, %p2251_p11 }
  0x4b   :  { %2261 = shalt.err (!%p2258_p1)
}
  0x4c   :  { %86 = dma.hbm_to_vmem [thread:$0]  %s2820_s7, 16, %s84_s8, [#allocation9]  }
  0x4d   :  { %s2344_s22 = smov [#allocation13]   ;;  %s2345_s23 = smov [#allocation14]  }
  0x4e   :  { %s105_s2 = sshll.u32 %s2344_s22, 4  ;;  %s122_s24 = sshll.u32 %s2345_s23, 4  ;;  %s106_s2 = int_to_ptr.vmem [resolvable:$true] %s105_s2  ;;  %s123_s24 = int_to_ptr.vmem [resolvable:$true] %s122_s24 }
  0x4f   :  { %s2270_s27 = scalar_lea.vmem %s106_s2, 16  ;;  %s2274_s3 = scalar_lea.vmem %s106_s2, 32 }
  0x50   :  { %p2271_p2 = scmp.ne.s32.totalorder %s106_s2, %s2270_s27  ;;  %p2275_p3 = scmp.lt.s32.totalorder %s106_s2, %s106_s2 }
  0x51   :  { %p2276_p4 = scmp.lt.s32.totalorder %s2274_s3, %s2270_s27 }
  0x53   :  { %p2277_p5 = por %p2276_p4, %p2275_p3 }
  0x55   :  { %p2278_p6 = pnand %p2277_p5, %p2271_p2 }
  0x57   :  { %2281 = shalt.err (!%p2278_p6)
}
  0x58   :  { %108 = dma.hbm_to_vmem [thread:$0]  %s2822_s9, 16, %s106_s2, [#allocation12]  }
  0x59   :  { %s2290_s0 = scalar_lea.vmem %s123_s24, 256  ;;  %p2295_p8 = scmp.lt.s32.totalorder %s123_s24, %s123_s24 }
  0x5a   :  { %p2291_p7 = scmp.ne.s32.totalorder %s123_s24, %s2290_s0  ;;  %p2296_p9 = scmp.lt.s32.totalorder %s2290_s0, %s2290_s0 }
  0x5c   :  { %p2297_p10 = por %p2296_p9, %p2295_p8 }
  0x5e   :  { %p2298_p11 = pnand %p2297_p10, %p2291_p7 }
  0x60   :  { %2301 = shalt.err (!%p2298_p11)
}
  0x61   :  { %128 = dma.hbm_to_vmem [thread:$0]  %s2827_s14, 256, %s123_s24, [#allocation15], %s2337_s28, %s2337_s28, %s2338_s29  }
  0x62   :  { %2322 = dma.done.wait [#allocation3], 64  }
  0x63   :  { %2323 = vsyncadd [#allocation3], 4294967232 }
  0x64   :  { %2324 = dma.done.wait [#allocation6], 32  }
  0x65   :  { %2325 = vsyncadd [#allocation6], 4294967264 }
  0x66   :  { %2326 = dma.done.wait [#allocation9], 32  }
  0x67   :  { %2327 = vsyncadd [#allocation9], 4294967264 }
  0x68   :  { %2328 = dma.done.wait [#allocation12], 272  }
  0x69   :  { %2329 = vsyncadd [#allocation12], 4294967024 }
  0x6a   :  { %2330 = dma.done.wait [#allocation15], 256  }
  0x6b   :  { %2331 = vsyncadd [#allocation15], 4294967040  ;;  %vm170_vm0 = vcmask 261120   ;;  %s2838_s5 = sld [smem:[#allocation23_spill]]  ;;  %v2082_v14 = vld [vmem:[%s2817_s4 + $0x8] sm:$0xff]   ;;  %v2083_v15 = vld [vmem:[#allocation11 + $0x8] sm:$0xff]  }
  0x6c   :  { %v2346_v16 = vmov 0.0   ;;  %v2084_v17 = vld [vmem:[%s2817_s4] sm:$0xff]   ;;  %v2085_v18 = vld [vmem:[#allocation11] sm:$0xff]   ;;  %vm2347_vm1 = vmmov 0   ;;  %v1784_v56 = vld [vmem:[#allocation10] ss:$0 sm:$0xff] }
  0x6d   :  { %1898 = vmatprep.subr.bf16.mxu1 %v2346_v16  ;;  %1914 = vmatprep.subr.bf16.mxu0 %v2346_v16  ;;  %v1778_v35 = vld [vmem:[#allocation5] ss:$0 sm:$0xff]  ;;  %v1779_v41 = vld [vmem:[#allocation7] ss:$0 sm:$0xff]  ;;  %v2086_v45 = vld [vmem:[%s2819_s6 + $0x8] sm:$0xff]   ;;  %vm447_vm6 = vcmask 64512  }
  0x6e   :  { %1899 = vmatpush3.bf16.msra.mxu1 %v2082_v14  ;;  %1915 = vmatpush3.bf16.msra.mxu0 %v2083_v15  ;;  %v2087_v47 = vld [vmem:[%s2819_s6] sm:$0xff]   ;;  %v1788_v59 = vld [vmem:[#allocation13] ss:$0 sm:$0xff]  ;;  %v1780_v62 = vld [vmem:[#allocation8] ss:$0 sm:$0xff]  ;;  %vm571_vm7 = vcmask 1043456  }
  0x6f   :  { %1900 = vmatprep.subr.bf16.mxu1 %v2346_v16  ;;  %1916 = vmatprep.subr.bf16.mxu0 %v2346_v16  ;;  %s2348_s6 = smov 120   ;;  %s2349_s23 = smov 112   ;;  %vm1708_vm14 = vcmask 523264  }
  0x70   :  { %1902 = vmatprep.mubr.msk.bf16.mxu1 %vm2347_vm1, %v2346_v16  ;;  %1918 = vmatprep.mubr.msk.bf16.mxu0 %vm2347_vm1, %v2346_v16  ;;  %s2350_s26 = smov 104  }
  0x71   :  { %v2482_v0 = vld [vmem:[%s2838_s5] sm:$0xff]  ;;  %v2487_v1 = vld [vmem:[%s2838_s5 + $0x8] sm:$0xff] }
  0x72   :  { %v171_v2 = vsel %vm170_vm0, %v2482_v0, 0.0  ;;  %v174_v3 = vsel %vm170_vm0, %v2487_v1, 0.0  ;;  %1901 = vmatpush3.bf16.msra.mxu1 %v2084_v17  ;;  %1917 = vmatpush3.bf16.msra.mxu0 %v2085_v18  ;;  %v1838_v18 = vld [vmem:[#allocation2] sm:$0xf]  }
  0x73   :  { %172 = vadd.xlane.f32.xlu0 %v171_v2  ;;  %1906 = vmatprep.subr.bf16.mxu1 %v2346_v16 }
  0x74   :  { %1928 = vmatprep.subr.bf16.mxu0 %v2346_v16 }
  0x77   :  { %175 = vadd.xlane.f32.xlu0 %v174_v3 }
  0xfc   :  { %v173_v4 = vpop.xlane.xlu0 %172 }
  0xfd   :  { %v178_v5 = vmul.f32 0.03125, %v173_v4 }
  0xff   :  { %v180_v6 = vsub.f32 %v2482_v0, %v178_v5 }
 0x100   :  { %v176_v7 = vpop.xlane.xlu0 %175 }
 0x101   :  { %v179_v8 = vmul.f32 0.03125, %v176_v7  ;;  %v182_v9 = vmul.f32 %v180_v6, %v180_v6  ;;  %v213_v37 = vmul.f32 %v1778_v35, %v180_v6 }
 0x103   :  { %v181_v10 = vsub.f32 %v2487_v1, %v179_v8  ;;  %v184_v11 = vsel %vm170_vm0, %v182_v9, 0.0 }
 0x104   :  { %185 = vadd.xlane.f32.xlu1 %v184_v11 }
 0x105   :  { %v183_v12 = vmul.f32 %v181_v10, %v181_v10  ;;  %v214_v38 = vmul.f32 %v1778_v35, %v181_v10 }
 0x107   :  { %v187_v13 = vsel %vm170_vm0, %v183_v12, 0.0 }
 0x108   :  { %188 = vadd.xlane.f32.xlu1 %v187_v13 }
 0x18d   :  { %v186_v19 = vpop.xlane.xlu1 %185 }
 0x18e   :  { %v191_v20 = vmul.f32 0.032258064, %v186_v19  ;;  %v1839_v19 = vunpack.c.0.s8 %v1838_v18 }
 0x190   :  { %2094 = vrsqrt.f32 %v191_v20  ;;  %vm195_vm2 = vcmp.eq.f32.partialorder %v191_v20, inf  ;;  %v198_v25 = vand.u32 2147483648, %v191_v20  ;;  %vm197_vm3 = vcmp.eq.f32.partialorder %v191_v20, 0.0 }
 0x191   :  { %v189_v21 = vpop.xlane.xlu1 %188  ;;  %vm2562_vm8 = vcmp.eq.s32.totalorder %v1839_v19, 0 }
 0x192   :  { %v192_v22 = vmul.f32 0.032258064, %v189_v21 }
 0x194   :  { %2096 = vrsqrt.f32 %v192_v22  ;;  %vm202_vm4 = vcmp.eq.f32.partialorder %v192_v22, inf  ;;  %v205_v31 = vand.u32 2147483648, %v192_v22  ;;  %vm204_vm5 = vcmp.eq.f32.partialorder %v192_v22, 0.0 }
 0x19d   :  { %v2095_v23 = vpop.eup %2094 }
 0x19e   :  { %v194_v24 = vmul.f32 %v2095_v23, %v191_v20 }
 0x1a0   :  { %v196_v26 = vsel %vm195_vm2, %v191_v20, %v194_v24 }
 0x1a1   :  { %v2097_v27 = vpop.eup %2096  ;;  %v199_v28 = vsel %vm197_vm3, %v198_v25, %v196_v26 }
 0x1a2   :  { %v215_v29 = vadd.f32 1e-06, %v199_v28  ;;  %v201_v30 = vmul.f32 %v2097_v27, %v192_v22 }
 0x1a4   :  { %2098 = vrcp.f32 %v215_v29  ;;  %v203_v32 = vsel %vm202_vm4, %v192_v22, %v201_v30  ;;  %v1840_v22 = vunpack.c.1.s8 %v1838_v18 }
 0x1a5   :  { %v206_v33 = vsel %vm204_vm5, %v205_v31, %v203_v32 }
 0x1a6   :  { %v216_v34 = vadd.f32 1e-06, %v206_v33  ;;  %vm2569_vm9 = vcmp.eq.s32.totalorder %v1840_v22, 0 }
 0x1a8   :  { %2100 = vrcp.f32 %v216_v34 }
 0x1b1   :  { %v2099_v36 = vpop.eup %2098 }
 0x1b2   :  { %v218_v39 = vmul.f32 %v2099_v36, %v213_v37 }
 0x1b4   :  { %v227_v43 = vadd.f32 %v1779_v41, %v218_v39 }
 0x1b5   :  { %v2101_v40 = vpop.eup %2100 }
 0x1b6   :  { %v220_v42 = vmul.f32 %v2101_v40, %v214_v38 }
 0x1b8   :  { %v228_v44 = vadd.f32 %v1779_v41, %v220_v42 }
 0x1ba   :  { %v229_v46 = vpack.c.bf16 %v228_v44, %v227_v43 }
 0x1bc   :  { %1903 = vmatmul.mubr.msk.bf16.vlgmr.msra.gmra.mxu1 %vm170_vm0, %v229_v46  ;;  %1919 = vmatmul.mubr.msk.bf16.vlgmr.msra.gmra.mxu0 %vm170_vm0, %v229_v46 }
 0x1bd   :  { %1907 = vmatpush3.bf16.msra.mxu1 %v2086_v45  ;;  %1910 = vmatprep.mubr.msk.bf16.mxu1 %vm2347_vm1, %v2346_v16 }
 0x1be   :  { %1908 = vmatprep.subr.bf16.mxu1 %v2346_v16  ;;  %1930 = vmatprep.mubr.msk.bf16.mxu0 %vm2347_vm1, %v2346_v16 }
 0x1c1   :  { %1909 = vmatpush3.bf16.msra.mxu1 %v2087_v47 }
 0x1c2   :  { %1922 = vmatprep.subr.bf16.mxu1 %v2346_v16 }
 0x1c4   :  { %1911 = vmatmul.mubr.msk.bf16.vlgmr.msra.gmra.mxu1 %vm170_vm0, %v229_v46 }
 0x1c5   :  { %1924 = vmatprep.mubr.msk.bf16.mxu1 %vm2347_vm1, %v2346_v16 }
 0x27c   :  { %v290_v48 = vpop.f32.mrf.mxu1  ;;  %v418_v49 = vpop.f32.mrf.mxu0 }
 0x27d   :  { %v419_v2 = vadd.f32 %v1788_v59, %v418_v49  ;;  %v291_v6 = vadd.f32 %v1780_v62, %v290_v48 }
 0x27e   :  { %v1904_v50 = vpop.f32.mrf.mxu1  ;;  %v1920_v51 = vpop.f32.mrf.mxu0 }
 0x27f   :  { %v2537_v8 = vpack.c.bf16 %v419_v2, %v419_v2  ;;  %v2541_v11 = vpack.c.bf16 %v291_v6, %v291_v6 }
 0x280   :  { %v293_v52 = vpop.f32.mrf.mxu1  ;;  %v421_v53 = vpop.f32.mrf.mxu0 }
 0x281   :  { %v422_v9 = vadd.f32 %v1788_v59, %v421_v53  ;;  %v294_v12 = vadd.f32 %v1780_v62, %v293_v52  ;;  %v573_v14 = vsel %vm571_vm7, %v2537_v8, 0 }
 0x282   :  { %v1905_v54 = vpop.f32.mrf.mxu1  ;;  %v1921_v55 = vpop.f32.mrf.mxu0 }
 0x283   :  { %v2544_v13 = vpack.c.bf16 %v422_v9, %v422_v9  ;;  %v2552_v15 = vpack.c.bf16 %v294_v12, %v294_v12 }
 0x284   :  { %v354_v57 = vpop.f32.mrf.mxu1 }
 0x285   :  { %v355_v58 = vadd.f32 %v1784_v56, %v354_v57  ;;  %v619_v17 = vsel %vm571_vm7, %v2544_v13, 0 }
 0x286   :  { %v1912_v60 = vpop.f32.mrf.mxu1 }
 0x287   :  { %v2530_v61 = vpack.c.bf16 %v355_v58, %v355_v58 }
 0x288   :  { %v357_v63 = vpop.f32.mrf.mxu1 }
 0x289   :  { %v358_v3 = vadd.f32 %v1784_v56, %v357_v63  ;;  %v452_v4 = vsel %vm447_vm6, %v2530_v61, 0 }
 0x28a   :  { %v1913_v5 = vpop.f32.mrf.mxu1  ;;  %1923 = vmatpush3.bf16.xpose.msra.mxu1 %v452_v4 }
 0x28b   :  { %v2534_v7 = vpack.c.bf16 %v358_v3, %v358_v3  ;;  %1934 = vmatprep.subr.bf16.mxu1 %v2346_v16 }
 0x28d   :  { %v498_v10 = vsel %vm447_vm6, %v2534_v7, 0 }
 0x28e   :  { %1929 = vmatpush3.bf16.xpose.msra.mxu0 %v498_v10 }
 0x28f   :  { %1940 = vmatprep.subr.bf16.mxu0 %v2346_v16 }
 0x291   :  { %1925 = vmatmul.mubr.msk.bf16.vlgmr.msra.gmra.mxu1 %vm447_vm6, %v2541_v11 }
 0x292   :  { %1935 = vmatpush3.bf16.msra.mxu1 %v573_v14  ;;  %1936 = vmatprep.mubr.msk.bf16.mxu1 %vm2347_vm1, %v2346_v16 }
 0x293   :  { %1946 = vmatprep.subr.bf16.mxu1 %v2346_v16 }
 0x295   :  { %1931 = vmatmul.mubr.msk.bf16.vlgmr.msra.gmra.mxu0 %vm447_vm6, %v2552_v15 }
 0x296   :  { %1941 = vmatpush3.bf16.msra.mxu0 %v619_v17  ;;  %1942 = vmatprep.mubr.msk.bf16.mxu0 %vm2347_vm1, %v2346_v16 }
 0x297   :  { %1952 = vmatprep.subr.bf16.mxu0 %v2346_v16 }
 0x351   :  { %v488_v20 = vpop.f32.mrf.mxu1 }
 0x352   :  { %v540_v23 = vmul.f32 0.35355338, %v488_v20 }
 0x353   :  { %v1926_v24 = vpop.f32.mrf.mxu1 }
 0x354   :  { %v542_v25 = vsel %vm2562_vm8, -1e+09, %v540_v23 }
 0x355   :  { %v491_v26 = vpop.f32.mrf.mxu1  ;;  %v534_v27 = vpop.f32.mrf.mxu0  ;;  %v544_v28 = vsel %vm447_vm6, %v542_v25, -inf }
 0x356   :  { %v541_v30 = vmul.f32 0.35355338, %v534_v27  ;;  %545 = vmax.xlane.f32.xlu0 %v544_v28 }
 0x357   :  { %v1927_v31 = vpop.f32.mrf.mxu1  ;;  %v1932_v32 = vpop.f32.mrf.mxu0 }
 0x358   :  { %v543_v33 = vsel %vm2569_vm9, -1e+09, %v541_v30 }
 0x359   :  { %v537_v34 = vpop.f32.mrf.mxu0  ;;  %v547_v35 = vsel %vm447_vm6, %v543_v33, -inf }
 0x35a   :  { %548 = vmax.xlane.f32.xlu1 %v547_v35 }
 0x35b   :  { %v1933_v36 = vpop.f32.mrf.mxu0 }
 0x36b   :  { %714 = vrot.lane.b32.xlu1 %v2534_v7, %s2348_s6 }
 0x3df   :  { %v546_v37 = vpop.xlane.xlu0 %545 }
 0x3e0   :  { %v550_v38 = vsub.f32 %v542_v25, %v546_v37 }
 0x3e2   :  { %v552_v39 = vmul.f32 1.442695, %v550_v38 }
 0x3e3   :  { %v549_v40 = vpop.xlane.xlu1 %548 }
 0x3e4   :  { %2102 = vpow2.f32 %v552_v39  ;;  %v551_v41 = vsub.f32 %v543_v33, %v549_v40 }
 0x3e6   :  { %v554_v42 = vmul.f32 1.442695, %v551_v41 }
 0x3e7   :  { %v715_v47 = vpop.permute.xlu1 %714 }
 0x3e8   :  { %2104 = vpow2.f32 %v554_v42  ;;  %v720_v58 = vsel %vm447_vm6, %v715_v47, 0 }
 0x3f1   :  { %v2103_v43 = vpop.eup %2102 }
 0x3f2   :  { %v556_v44 = vsel %vm447_vm6, %v2103_v43, 0.0 }
 0x3f3   :  { %557 = vadd.xlane.f32.xlu0 %v556_v44 }
 0x3f5   :  { %v2105_v45 = vpop.eup %2104 }
 0x3f6   :  { %v559_v46 = vsel %vm447_vm6, %v2105_v45, 0.0 }
 0x3f7   :  { %560 = vadd.xlane.f32.xlu1 %v559_v46 }
 0x408   :  { %662 = vrot.lane.b32.xlu1 %v2541_v11, %s2348_s6 }
 0x409   :  { %664 = vrot.lane.b32.xlu0 %v2530_v61, %s2348_s6 }
 0x40c   :  { %712 = vrot.lane.b32.xlu1 %v2552_v15, %s2348_s6 }
 0x47c   :  { %v558_v48 = vpop.xlane.xlu0 %557 }
 0x47d   :  { %2106 = vrcp.f32 %v558_v48 }
 0x480   :  { %v561_v49 = vpop.xlane.xlu1 %560  ;;  %v665_v52 = vpop.permute.xlu0 %664 }
 0x481   :  { %2108 = vrcp.f32 %v561_v49  ;;  %v670_v55 = vsel %vm447_vm6, %v665_v52, 0 }
 0x484   :  { %v663_v59 = vpop.permute.xlu1 %662 }
 0x488   :  { %v713_v60 = vpop.permute.xlu1 %712 }
 0x48a   :  { %v2107_v50 = vpop.eup %2106 }
 0x48b   :  { %v564_v51 = vmul.f32 %v2107_v50, %v2103_v43 }
 0x48d   :  { %v566_v53 = vpack.c.bf16 %v564_v51, %v564_v51  ;;  %v428_v51 = vld [vmem:[%s2823_s10] sm:$0xf] }
 0x48e   :  { %v2109_v54 = vpop.eup %2108 }
 0x48f   :  { %1937 = vmatmul.mubr.msk.bf16.vlgmr.msra.gmra.mxu1 %vm447_vm6, %v566_v53  ;;  %v565_v56 = vmul.f32 %v2109_v54, %v2105_v45  ;;  %v938_v54 = vsel %vm571_vm7, %v428_v51, 0 }
 0x490   :  { %1947 = vmatpush3.bf16.xpose.msra.mxu1 %v670_v55  ;;  %1948 = vmatprep.mubr.msk.bf16.mxu1 %vm2347_vm1, %v2346_v16 }
 0x491   :  { %v567_v57 = vpack.c.bf16 %v565_v56, %v565_v56  ;;  %1958 = vmatprep.subr.bf16.mxu1 %v2346_v16 }
 0x493   :  { %1943 = vmatmul.mubr.msk.bf16.vlgmr.msra.gmra.mxu0 %vm447_vm6, %v567_v57 }
 0x494   :  { %1953 = vmatpush3.bf16.xpose.msra.mxu0 %v720_v58  ;;  %1954 = vmatprep.mubr.msk.bf16.mxu0 %vm2347_vm1, %v2346_v16 }
 0x495   :  { %1964 = vmatprep.subr.bf16.mxu0 %v2346_v16 }
 0x497   :  { %1949 = vmatmul.mubr.msk.bf16.vlgmr.msra.gmra.mxu1 %vm447_vm6, %v663_v59  ;;  %v429_v59 = vld [vmem:[%s2823_s10 + $0x4] sm:$0xf] }
 0x498   :  { %1960 = vmatprep.mubr.msk.bf16.mxu1 %vm2347_vm1, %v2346_v16 }
 0x49b   :  { %1955 = vmatmul.mubr.msk.bf16.vlgmr.msra.gmra.mxu0 %vm447_vm6, %v713_v60  ;;  %v891_v60 = vsel %vm571_vm7, %v429_v59, 0 }
 0x49c   :  { %1966 = vmatprep.mubr.msk.bf16.mxu0 %vm2347_vm1, %v2346_v16 }
 0x54f   :  { %v2602_v62 = vpop.f32.mrf.mxu1 }
 0x551   :  { %v1938_v63 = vpop.f32.mrf.mxu1 }
 0x553   :  { %v612_v2 = vpop.f32.mrf.mxu1  ;;  %v2604_v3 = vpop.f32.mrf.mxu0 }
 0x554   :  { %v661_v4 = vpack.c.bf16 %v2604_v3, %v2602_v62 }
 0x555   :  { %v1939_v5 = vpop.f32.mrf.mxu1  ;;  %v1944_v6 = vpop.f32.mrf.mxu0 }
 0x557   :  { %v658_v9 = vpop.f32.mrf.mxu0  ;;  %v706_v10 = vpop.f32.mrf.mxu1 }
 0x558   :  { %v762_v12 = vmul.f32 0.35355338, %v706_v10 }
 0x559   :  { %v1945_v14 = vpop.f32.mrf.mxu0  ;;  %v1950_v17 = vpop.f32.mrf.mxu1 }
 0x55a   :  { %v764_v18 = vsel %vm2562_vm8, -1e+09, %v762_v12 }
 0x55b   :  { %v709_v19 = vpop.f32.mrf.mxu1  ;;  %v756_v20 = vpop.f32.mrf.mxu0  ;;  %v766_v22 = vsel %vm447_vm6, %v764_v18, -inf }
 0x55c   :  { %v763_v23 = vmul.f32 0.35355338, %v756_v20  ;;  %767 = vmax.xlane.f32.xlu0 %v766_v22 }
 0x55d   :  { %v1951_v24 = vpop.f32.mrf.mxu1  ;;  %v1956_v25 = vpop.f32.mrf.mxu0 }
 0x55e   :  { %v765_v26 = vsel %vm2569_vm9, -1e+09, %v763_v23 }
 0x55f   :  { %v759_v27 = vpop.f32.mrf.mxu0  ;;  %v769_v28 = vsel %vm447_vm6, %v765_v26, -inf }
 0x560   :  { %770 = vmax.xlane.f32.xlu1 %v769_v28 }
 0x561   :  { %v1957_v30 = vpop.f32.mrf.mxu0 }
 0x571   :  { %838 = vrot.lane.b32.xlu1 %v2544_v13, %s2348_s6 }
 0x575   :  { %983 = vrot.lane.b32.xlu1 %v2530_v61, %s2349_s23 }
 0x579   :  { %1033 = vrot.lane.b32.xlu1 %v2534_v7, %s2349_s23 }
 0x57d   :  { %1031 = vrot.lane.b32.xlu1 %v2552_v15, %s2349_s23 }
 0x5e5   :  { %v768_v31 = vpop.xlane.xlu0 %767 }
 0x5e6   :  { %v772_v32 = vsub.f32 %v764_v18, %v768_v31 }
 0x5e8   :  { %v774_v33 = vmul.f32 1.442695, %v772_v32 }
 0x5e9   :  { %v771_v34 = vpop.xlane.xlu1 %770 }
 0x5ea   :  { %2110 = vpow2.f32 %v774_v33  ;;  %v773_v35 = vsub.f32 %v765_v26, %v771_v34 }
 0x5ec   :  { %v776_v36 = vmul.f32 1.442695, %v773_v35 }
 0x5ed   :  { %v839_v37 = vpop.permute.xlu1 %838 }
 0x5ee   :  { %2112 = vpow2.f32 %v776_v36  ;;  %v844_v38 = vsel %vm571_vm7, %v839_v37, 0 }
 0x5ef   :  { %1965 = vmatpush3.bf16.msra.mxu0 %v844_v38 }
 0x5f0   :  { %1976 = vmatprep.subr.bf16.mxu0 %v2346_v16 }
 0x5f1   :  { %v984_v55 = vpop.permute.xlu1 %983 }
 0x5f2   :  { %v989_v9 = vsel %vm447_vm6, %v984_v55, 0 }
 0x5f5   :  { %v1034_v56 = vpop.permute.xlu1 %1033 }
 0x5f6   :  { %v1039_v57 = vsel %vm447_vm6, %v1034_v56, 0 }
 0x5f7   :  { %v2111_v39 = vpop.eup %2110 }
 0x5f8   :  { %v778_v40 = vsel %vm447_vm6, %v2111_v39, 0.0 }
 0x5f9   :  { %779 = vadd.xlane.f32.xlu0 %v778_v40  ;;  %v1032_v58 = vpop.permute.xlu1 %1031 }
 0x5fb   :  { %v2113_v41 = vpop.eup %2112 }
 0x5fc   :  { %v781_v42 = vsel %vm447_vm6, %v2113_v41, 0.0 }
 0x5fd   :  { %782 = vadd.xlane.f32.xlu0 %v781_v42 }
 0x613   :  { %790 = vrot.lane.b32.xlu0 %v2537_v8, %s2348_s6 }
 0x617   :  { %981 = vrot.lane.b32.xlu0 %v2541_v11, %s2349_s23 }
 0x682   :  { %v780_v43 = vpop.xlane.xlu0 %779 }
 0x683   :  { %2114 = vrcp.f32 %v780_v43 }
 0x686   :  { %v783_v44 = vpop.xlane.xlu0 %782 }
 0x687   :  { %2116 = vrcp.f32 %v783_v44 }
 0x68a   :  { %v791_v45 = vpop.permute.xlu0 %790 }
 0x68b   :  { %v796_v46 = vsel %vm571_vm7, %v791_v45, 0 }
 0x68c   :  { %1959 = vmatpush3.bf16.msra.mxu1 %v796_v46 }
 0x68d   :  { %1970 = vmatprep.subr.bf16.mxu1 %v2346_v16 }
 0x68e   :  { %v982_v17 = vpop.permute.xlu0 %981 }
 0x690   :  { %v2115_v47 = vpop.eup %2114 }
 0x691   :  { %v786_v48 = vmul.f32 %v2115_v47, %v2111_v39 }
 0x693   :  { %v788_v49 = vpack.c.bf16 %v786_v48, %v786_v48 }
 0x694   :  { %v2117_v50 = vpop.eup %2116 }
 0x695   :  { %1961 = vmatmul.mubr.msk.bf16.vlgmr.msra.gmra.mxu1 %vm447_vm6, %v788_v49  ;;  %v787_v52 = vmul.f32 %v2117_v50, %v2113_v41 }
 0x696   :  { %1972 = vmatprep.mubr.msk.bf16.mxu1 %vm2347_vm1, %v2346_v16  ;;  %1971 = vmatpush3.bf16.msra.mxu1 %v891_v60 }
 0x697   :  { %v789_v53 = vpack.c.bf16 %v787_v52, %v787_v52  ;;  %1982 = vmatprep.subr.bf16.mxu1 %v2346_v16 }
 0x699   :  { %1967 = vmatmul.mubr.msk.bf16.vlgmr.msra.gmra.mxu0 %vm447_vm6, %v789_v53 }
 0x69a   :  { %1977 = vmatpush3.bf16.msra.mxu0 %v938_v54  ;;  %1978 = vmatprep.mubr.msk.bf16.mxu0 %vm2347_vm1, %v2346_v16 }
 0x69b   :  { %1988 = vmatprep.subr.bf16.mxu0 %v2346_v16 }
 0x6a1   :  { %1979 = vmatmul.mubr.msk.bf16.vlgmr.msra.gmra.mxu0 %vm447_vm6, %v661_v4 }
 0x6a2   :  { %1989 = vmatpush3.bf16.xpose.msra.mxu0 %v1039_v57  ;;  %1990 = vmatprep.mubr.msk.bf16.mxu0 %vm2347_vm1, %v2346_v16 }
 0x6a3   :  { %2000 = vmatprep.subr.bf16.mxu0 %v2346_v16 }
 0x6a9   :  { %1991 = vmatmul.mubr.msk.bf16.vlgmr.msra.gmra.mxu0 %vm447_vm6, %v1032_v58 }
 0x6aa   :  { %2002 = vmatprep.mubr.msk.bf16.mxu0 %vm2347_vm1, %v2346_v16 }
 0x755   :  { %v832_v62 = vpop.f32.mrf.mxu1 }
 0x757   :  { %v1962_v63 = vpop.f32.mrf.mxu1 }
 0x759   :  { %v835_v2 = vpop.f32.mrf.mxu1  ;;  %v880_v3 = vpop.f32.mrf.mxu0 }
 0x75a   :  { %v886_v4 = vpack.c.bf16 %v880_v3, %v832_v62 }
 0x75b   :  { %v1963_v5 = vpop.f32.mrf.mxu1  ;;  %v1968_v6 = vpop.f32.mrf.mxu0 }
 0x75c   :  { %1973 = vmatmul.mubr.msk.bf16.vlgmr.msra.gmra.mxu1 %vm447_vm6, %v886_v4  ;;  %v430_v5 = vld [vmem:[%s2823_s10 + $0x8] sm:$0xf] }
 0x75d   :  { %1983 = vmatpush3.bf16.xpose.msra.mxu1 %v989_v9  ;;  %v883_v10 = vpop.f32.mrf.mxu0  ;;  %1984 = vmatprep.mubr.msk.bf16.mxu1 %vm2347_vm1, %v2346_v16  ;;  %v1210_v6 = vsel %vm571_vm7, %v430_v5, 0 }
 0x75e   :  { %1994 = vmatprep.subr.bf16.mxu1 %v2346_v16 }
 0x75f   :  { %v1969_v12 = vpop.f32.mrf.mxu0 }
 0x761   :  { %v2664_v14 = vpop.f32.mrf.mxu0 }
 0x763   :  { %v1980_v18 = vpop.f32.mrf.mxu0 }
 0x764   :  { %1985 = vmatmul.mubr.msk.bf16.vlgmr.msra.gmra.mxu1 %vm447_vm6, %v982_v17 }
 0x765   :  { %v2667_v19 = vpop.f32.mrf.mxu0  ;;  %1996 = vmatprep.mubr.msk.bf16.mxu1 %vm2347_vm1, %v2346_v16 }
 0x767   :  { %v1981_v20 = vpop.f32.mrf.mxu0 }
 0x769   :  { %v1075_v22 = vpop.f32.mrf.mxu0 }
 0x76a   :  { %v1082_v23 = vmul.f32 0.35355338, %v1075_v22 }
 0x76b   :  { %v1992_v24 = vpop.f32.mrf.mxu0 }
 0x76c   :  { %v1084_v25 = vsel %vm2569_vm9, -1e+09, %v1082_v23 }
 0x76d   :  { %v1078_v26 = vpop.f32.mrf.mxu0  ;;  %v1088_v27 = vsel %vm447_vm6, %v1084_v25, -inf }
 0x76e   :  { %1089 = vmax.xlane.f32.xlu1 %v1088_v27 }
 0x76f   :  { %v1993_v28 = vpop.f32.mrf.mxu0 }
 0x77f   :  { %1157 = vrot.lane.b32.xlu1 %v2544_v13, %s2349_s23 }
 0x783   :  { %1257 = vrot.lane.b32.xlu1 %v2530_v61, %s2350_s26 }
 0x787   :  { %1307 = vrot.lane.b32.xlu1 %v2534_v7, %s2350_s26 }
 0x78b   :  { %1305 = vrot.lane.b32.xlu1 %v2552_v15, %s2350_s26 }
 0x7f7   :  { %v1090_v30 = vpop.xlane.xlu1 %1089 }
 0x7f8   :  { %v1092_v33 = vsub.f32 %v1084_v25, %v1090_v30 }
 0x7fa   :  { %v1095_v34 = vmul.f32 1.442695, %v1092_v33 }
 0x7fb   :  { %v1158_v31 = vpop.permute.xlu1 %1157 }
 0x7fc   :  { %v1163_v32 = vsel %vm571_vm7, %v1158_v31, 0  ;;  %2118 = vpow2.f32 %v1095_v34 }
 0x7fd   :  { %2001 = vmatpush3.bf16.msra.mxu0 %v1163_v32 }
 0x7fe   :  { %2012 = vmatprep.subr.bf16.mxu0 %v2346_v16 }
 0x7ff   :  { %v1258_v53 = vpop.permute.xlu1 %1257 }
 0x800   :  { %v1263_v55 = vsel %vm447_vm6, %v1258_v53, 0 }
 0x803   :  { %v1308_v23 = vpop.permute.xlu1 %1307 }
 0x804   :  { %v1313_v27 = vsel %vm447_vm6, %v1308_v23, 0 }
 0x807   :  { %v1306_v30 = vpop.permute.xlu1 %1305 }
 0x809   :  { %v2119_v42 = vpop.eup %2118 }
 0x80a   :  { %v1100_v44 = vsel %vm447_vm6, %v2119_v42, 0.0 }
 0x81c   :  { %v2684_v35 = vpop.f32.mrf.mxu1 }
 0x81e   :  { %v1974_v36 = vpop.f32.mrf.mxu1 }
 0x820   :  { %v2686_v61 = vpop.f32.mrf.mxu1 }
 0x822   :  { %v1975_v37 = vpop.f32.mrf.mxu1 }
 0x823   :  { %v975_v37 = vadd.f32 %v2664_v14, %v2684_v35 }
 0x824   :  { %v1025_v7 = vpop.f32.mrf.mxu1 }
 0x825   :  { %v1081_v38 = vmul.f32 0.35355338, %v1025_v7 }
 0x826   :  { %v1986_v39 = vpop.f32.mrf.mxu1 }
 0x827   :  { %v1083_v15 = vsel %vm2562_vm8, -1e+09, %v1081_v38 }
 0x828   :  { %v1028_v40 = vpop.f32.mrf.mxu1  ;;  %v1085_v41 = vsel %vm447_vm6, %v1083_v15, -inf }
 0x829   :  { %1086 = vmax.xlane.f32.xlu0 %v1085_v41 }
 0x82a   :  { %v1987_v43 = vpop.f32.mrf.mxu1 }
 0x82d   :  { %1101 = vadd.xlane.f32.xlu0 %v1100_v44 }
 0x8b2   :  { %v1087_v45 = vpop.xlane.xlu0 %1086 }
 0x8b3   :  { %v1091_v46 = vsub.f32 %v1083_v15, %v1087_v45  ;;  %v978_v15 = vadd.f32 %v2667_v19, %v2686_v61 }
 0x8b5   :  { %v1093_v47 = vmul.f32 1.442695, %v1091_v46 }
 0x8b6   :  { %v1102_v48 = vpop.xlane.xlu0 %1101 }
 0x8b7   :  { %2120 = vpow2.f32 %v1093_v47 }
 0x8b8   :  { %2122 = vrcp.f32 %v1102_v48 }
 0x8c4   :  { %v2121_v49 = vpop.eup %2120 }
 0x8c5   :  { %v2123_v50 = vpop.eup %2122  ;;  %v1097_v51 = vsel %vm447_vm6, %v2121_v49, 0.0 }
 0x8c6   :  { %1098 = vadd.xlane.f32.xlu0 %v1097_v51  ;;  %v1106_v52 = vmul.f32 %v2123_v50, %v2119_v42 }
 0x8c8   :  { %v1108_v54 = vpack.c.bf16 %v1106_v52, %v1106_v52 }
 0x8ca   :  { %2003 = vmatmul.mubr.msk.bf16.vlgmr.msra.gmra.mxu0 %vm447_vm6, %v1108_v54 }
 0x8cb   :  { %2013 = vmatpush3.bf16.xpose.msra.mxu0 %v1263_v55  ;;  %2014 = vmatprep.mubr.msk.bf16.mxu0 %vm2347_vm1, %v2346_v16 }
 0x8cc   :  { %2024 = vmatprep.subr.bf16.mxu0 %v2346_v16 }
 0x8dc   :  { %1109 = vrot.lane.b32.xlu0 %v2537_v8, %s2349_s23 }
 0x8e0   :  { %1255 = vrot.lane.b32.xlu0 %v2541_v11, %s2350_s26 }
 0x94f   :  { %v1099_v56 = vpop.xlane.xlu0 %1098 }
 0x950   :  { %2124 = vrcp.f32 %v1099_v56 }
 0x953   :  { %v1110_v57 = vpop.permute.xlu0 %1109 }
 0x954   :  { %v1115_v58 = vsel %vm571_vm7, %v1110_v57, 0 }
 0x955   :  { %1995 = vmatpush3.bf16.msra.mxu1 %v1115_v58 }
 0x956   :  { %2006 = vmatprep.subr.bf16.mxu1 %v2346_v16 }
 0x957   :  { %v1256_v59 = vpop.permute.xlu0 %1255 }
 0x958   :  { %2015 = vmatmul.mubr.msk.bf16.vlgmr.msra.gmra.mxu0 %vm447_vm6, %v1256_v59 }
 0x959   :  { %2026 = vmatprep.mubr.msk.bf16.mxu0 %vm2347_vm1, %v2346_v16 }
 0x95d   :  { %v2125_v60 = vpop.eup %2124 }
 0x95e   :  { %v1105_v62 = vmul.f32 %v2125_v60, %v2121_v49  ;;  %v431_v60 = vld [vmem:[%s2823_s10 + $0xc] sm:$0xf] }
 0x960   :  { %v1107_v63 = vpack.c.bf16 %v1105_v62, %v1105_v62  ;;  %v1484_v62 = vsel %vm571_vm7, %v431_v60, 0 }
 0x962   :  { %1997 = vmatmul.mubr.msk.bf16.vlgmr.msra.gmra.mxu1 %vm447_vm6, %v1107_v63 }
 0x963   :  { %2008 = vmatprep.mubr.msk.bf16.mxu1 %vm2347_vm1, %v2346_v16  ;;  %2007 = vmatpush3.bf16.msra.mxu1 %v1210_v6 }
 0x964   :  { %2018 = vmatprep.subr.bf16.mxu1 %v2346_v16 }
 0x98a   :  { %v1199_v11 = vpop.f32.mrf.mxu0 }
 0x98c   :  { %v2004_v2 = vpop.f32.mrf.mxu0 }
 0x98e   :  { %v1202_v3 = vpop.f32.mrf.mxu0 }
 0x990   :  { %v2005_v4 = vpop.f32.mrf.mxu0 }
 0xa18   :  { %v1299_v9 = vpop.f32.mrf.mxu0 }
 0xa19   :  { %v1355_v10 = vmul.f32 0.35355338, %v1299_v9 }
 0xa1a   :  { %v2016_v12 = vpop.f32.mrf.mxu0 }
 0xa1b   :  { %v1357_v17 = vsel %vm2562_vm8, -1e+09, %v1355_v10 }
 0xa1c   :  { %v1302_v18 = vpop.f32.mrf.mxu0  ;;  %v1359_v20 = vsel %vm447_vm6, %v1357_v17, -inf }
 0xa1d   :  { %1360 = vmax.xlane.f32.xlu0 %v1359_v20  ;;  %v1818_v18 = vld [vmem:[%s2824_s11] ss:$0 sm:$0xff] }
 0xa1e   :  { %v2017_v22 = vpop.f32.mrf.mxu0 }
 0xa22   :  { %v1151_v24 = vpop.f32.mrf.mxu1 }
 0xa23   :  { %v1205_v25 = vpack.c.bf16 %v1199_v11, %v1151_v24 }
 0xa24   :  { %v1998_v26 = vpop.f32.mrf.mxu1 }
 0xa25   :  { %2009 = vmatmul.mubr.msk.bf16.vlgmr.msra.gmra.mxu1 %vm447_vm6, %v1205_v25 }
 0xa26   :  { %2019 = vmatpush3.bf16.xpose.msra.mxu1 %v1313_v27  ;;  %v1154_v28 = vpop.f32.mrf.mxu1  ;;  %2020 = vmatprep.mubr.msk.bf16.mxu1 %vm2347_vm1, %v2346_v16 }
 0xa27   :  { %2030 = vmatprep.subr.bf16.mxu1 %v2346_v16 }
 0xa28   :  { %v1999_v21 = vpop.f32.mrf.mxu1 }
 0xa2d   :  { %2021 = vmatmul.mubr.msk.bf16.vlgmr.msra.gmra.mxu1 %vm447_vm6, %v1306_v30 }
 0xa2e   :  { %2032 = vmatprep.mubr.msk.bf16.mxu1 %vm2347_vm1, %v2346_v16 }
 0xaa6   :  { %v1361_v31 = vpop.xlane.xlu0 %1360 }
 0xaa7   :  { %v1365_v32 = vsub.f32 %v1357_v17, %v1361_v31 }
 0xaa9   :  { %v1367_v33 = vmul.f32 1.442695, %v1365_v32 }
 0xaab   :  { %2126 = vpow2.f32 %v1367_v33 }
 0xab8   :  { %v2127_v34 = vpop.eup %2126 }
 0xab9   :  { %v1371_v36 = vsel %vm447_vm6, %v2127_v34, 0.0 }
 0xaba   :  { %1372 = vadd.xlane.f32.xlu0 %v1371_v36 }
 0xae5   :  { %v1246_v7 = vpop.f32.mrf.mxu1 }
 0xae6   :  { %v1253_v38 = vadd.f32 %v1246_v7, %v975_v37 }
 0xae7   :  { %v2010_v39 = vpop.f32.mrf.mxu1 }
 0xae8   :  { %v2088_v39 = vld [vmem:[#allocation14 + $0x8] sm:$0xff]  }
 0xae9   :  { %v1249_v40 = vpop.f32.mrf.mxu1 }
 0xaea   :  { %v2731_v41 = vadd.f32 %v1249_v40, %v978_v15  ;;  %v2089_v15 = vld [vmem:[#allocation14] sm:$0xff]  }
 0xaeb   :  { %v2011_v42 = vpop.f32.mrf.mxu1  ;;  %v2090_v40 = vld [vmem:[%s2829_s16 + $0x18] sm:$0xff]  }
 0xaed   :  { %v1349_v43 = vpop.f32.mrf.mxu1 }
 0xaee   :  { %v1356_v44 = vmul.f32 0.35355338, %v1349_v43 }
 0xaef   :  { %v2022_v45 = vpop.f32.mrf.mxu1 }
 0xaf0   :  { %v1358_v46 = vsel %vm2569_vm9, -1e+09, %v1356_v44 }
 0xaf1   :  { %v1352_v47 = vpop.f32.mrf.mxu1  ;;  %v1362_v48 = vsel %vm447_vm6, %v1358_v46, -inf }
 0xaf2   :  { %1363 = vmax.xlane.f32.xlu1 %v1362_v48 }
 0xaf3   :  { %v2023_v14 = vpop.f32.mrf.mxu1 }
 0xb03   :  { %1431 = vrot.lane.b32.xlu1 %v2544_v13, %s2350_s26 }
 0xb43   :  { %v1373_v52 = vpop.xlane.xlu0 %1372 }
 0xb7b   :  { %v1364_v35 = vpop.xlane.xlu1 %1363 }
 0xb7c   :  { %v1366_v19 = vsub.f32 %v1358_v46, %v1364_v35 }
 0xb7e   :  { %v1369_v61 = vmul.f32 1.442695, %v1366_v19 }
 0xb7f   :  { %v1432_v49 = vpop.permute.xlu1 %1431 }
 0xb80   :  { %2128 = vpow2.f32 %v1369_v61  ;;  %v1437_v50 = vsel %vm571_vm7, %v1432_v49, 0 }
 0xb81   :  { %2031 = vmatpush3.bf16.msra.mxu1 %v1437_v50  ;;  %2130 = vrcp.f32 %v1373_v52  ;;  %v1819_v52 = vld [vmem:[%s2825_s12] ss:$0 sm:$0xff] }
 0xb82   :  { %2042 = vmatprep.subr.bf16.mxu1 %v2346_v16 }
 0xb8d   :  { %v2129_v29 = vpop.eup %2128 }
 0xb8e   :  { %v1374_v51 = vsel %vm447_vm6, %v2129_v29, 0.0  ;;  %v2131_v13 = vpop.eup %2130 }
 0xb8f   :  { %1375 = vadd.xlane.f32.xlu0 %v1374_v51  ;;  %v1379_v54 = vmul.f32 %v2131_v13, %v2127_v34 }
 0xb91   :  { %v1381_v57 = vpack.c.bf16 %v1379_v54, %v1379_v54 }
 0xba5   :  { %1383 = vrot.lane.b32.xlu0 %v2537_v8, %s2350_s26 }
 0xc18   :  { %v1376_v53 = vpop.xlane.xlu0 %1375 }
 0xc19   :  { %2132 = vrcp.f32 %v1376_v53 }
 0xc1c   :  { %v1384_v55 = vpop.permute.xlu0 %1383 }
 0xc1d   :  { %v1389_v56 = vsel %vm571_vm7, %v1384_v55, 0 }
 0xc1e   :  { %2025 = vmatpush3.bf16.msra.mxu0 %v1389_v56 }
 0xc1f   :  { %2036 = vmatprep.subr.bf16.mxu0 %v2346_v16 }
 0xc21   :  { %2027 = vmatmul.mubr.msk.bf16.vlgmr.msra.gmra.mxu0 %vm447_vm6, %v1381_v57  ;;  %v1820_v57 = vld [vmem:[%s2826_s13] ss:$0 sm:$0xff] }
 0xc22   :  { %2038 = vmatprep.mubr.msk.bf16.mxu0 %vm2347_vm1, %v2346_v16  ;;  %2037 = vmatpush3.bf16.msra.mxu0 %v1484_v62  ;;  %v2091_v62 = vld [vmem:[%s2829_s16 + $0x10] sm:$0xff]  }
 0xc23   :  { %2050 = vmatprep.subr.bf16.mxu0 %v2346_v16 }
 0xc26   :  { %v2133_v58 = vpop.eup %2132 }
 0xc27   :  { %v1380_v8 = vmul.f32 %v2133_v58, %v2129_v29 }
 0xc29   :  { %v1382_v59 = vpack.c.bf16 %v1380_v8, %v1380_v8 }
 0xc2b   :  { %2033 = vmatmul.mubr.msk.bf16.vlgmr.msra.gmra.mxu1 %vm447_vm6, %v1382_v59 }
 0xc2c   :  { %2046 = vmatprep.mubr.msk.bf16.mxu1 %vm2347_vm1, %v2346_v16  ;;  %2043 = vmatpush3.bf16.msra.mxu1 %v2088_v39 }
 0xc2d   :  { %2044 = vmatprep.subr.bf16.mxu1 %v2346_v16 }
 0xc30   :  { %2045 = vmatpush3.bf16.msra.mxu1 %v2089_v15 }
 0xce1   :  { %v1425_v63 = vpop.f32.mrf.mxu0 }
 0xce3   :  { %v2028_v11 = vpop.f32.mrf.mxu0 }
 0xce4   :  { %v2093_v11 = vld [vmem:[%s2829_s16] sm:$0xff]  }
 0xce5   :  { %v1428_v2 = vpop.f32.mrf.mxu0 }
 0xce6   :  { %v1821_v2 = vld [vmem:[%s2828_s15] ss:$0 sm:$0xff]  ;;  %s2351_s15 = smov [#allocation16]  }
 0xce7   :  { %v2029_v3 = vpop.f32.mrf.mxu0 }
 0xceb   :  { %v1473_v4 = vpop.f32.mrf.mxu1 }
 0xcec   :  { %v1479_v5 = vpack.c.bf16 %v1473_v4, %v1425_v63  ;;  %v2092_v63 = vld [vmem:[%s2829_s16 + $0x8] sm:$0xff]   ;;  %s1762_s16 = sshll.u32 %s2351_s15, 4  ;;  %s1763_s16 = int_to_ptr.vmem [resolvable:$true] %s1762_s16 }
 0xced   :  { %v2034_v6 = vpop.f32.mrf.mxu1  ;;  %s2302_s24 = scalar_lea.vmem %s1763_s16, 256  ;;  %p2307_p13 = scmp.lt.s32.totalorder %s1763_s16, %s1763_s16 }
 0xcee   :  { %2039 = vmatmul.mubr.msk.bf16.vlgmr.msra.gmra.mxu0 %vm447_vm6, %v1479_v5  ;;  %p2303_p12 = scmp.ne.s32.totalorder %s1763_s16, %s2302_s24  ;;  %p2308_p0 = scmp.lt.s32.totalorder %s2302_s24, %s2302_s24 }
 0xcef   :  { %v1476_v9 = vpop.f32.mrf.mxu1  ;;  %2058 = vmatprep.mubr.msk.bf16.mxu0 %vm2347_vm1, %v2346_v16  ;;  %2051 = vmatpush3.bf16.msra.mxu0 %v2090_v40 }
 0xcf0   :  { %2052 = vmatprep.subr.bf16.mxu0 %v2346_v16  ;;  %p2309_p1 = por %p2308_p0, %p2307_p13 }
 0xcf1   :  { %v2035_v10 = vpop.f32.mrf.mxu1 }
 0xcf2   :  { %p2310_p2 = pnand %p2309_p1, %p2303_p12 }
 0xcf3   :  { %2053 = vmatpush3.bf16.msra.mxu0 %v2091_v62 }
 0xcf4   :  { %2054 = vmatprep.subr.bf16.mxu0 %v2346_v16 }
 0xcf7   :  { %2055 = vmatpush3.bf16.msra.mxu0 %v2092_v63 }
 0xcf8   :  { %2056 = vmatprep.subr.bf16.mxu0 %v2346_v16  ;;  %v1825_v16 = vld [vmem:[%s2830_s17] ss:$0 sm:$0xff] }
 0xcfb   :  { %2057 = vmatpush3.bf16.msra.mxu0 %v2093_v11 }
 0xdae   :  { %v1520_v12 = vpop.f32.mrf.mxu0 }
 0xdaf   :  { %v1527_v17 = vadd.f32 %v1520_v12, %v1253_v38 }
 0xdb0   :  { %v2040_v20 = vpop.f32.mrf.mxu0 }
 0xdb1   :  { %v1529_v22 = vadd.f32 %v1527_v17, %v2482_v0 }
 0xdb2   :  { %v1523_v23 = vpop.f32.mrf.mxu0 }
 0xdb3   :  { %v2763_v24 = vadd.f32 %v1818_v18, %v1529_v22  ;;  %v1528_v25 = vadd.f32 %v1523_v23, %v2731_v41 }
 0xdb4   :  { %v2041_v26 = vpop.f32.mrf.mxu0 }
 0xdb5   :  { %v1530_v27 = vadd.f32 %v1528_v25, %v2487_v1  ;;  %v1542_v28 = vsel %vm170_vm0, %v2763_v24, 0.0 }
 0xdb6   :  { %1543 = vadd.xlane.f32.xlu1 %v1542_v28 }
 0xdb7   :  { %v2769_v21 = vadd.f32 %v1818_v18, %v1530_v27 }
 0xdb9   :  { %v1545_v30 = vsel %vm170_vm0, %v2769_v21, 0.0 }
 0xdba   :  { %1546 = vadd.xlane.f32.xlu0 %v1545_v30 }
 0xe3f   :  { %v1544_v31 = vpop.xlane.xlu1 %1543 }
 0xe40   :  { %v1548_v0 = vmul.f32 0.03125, %v1544_v31 }
 0xe42   :  { %v1550_v32 = vsub.f32 %v2763_v24, %v1548_v0 }
 0xe43   :  { %v1547_v33 = vpop.xlane.xlu0 %1546 }
 0xe44   :  { %v1549_v34 = vmul.f32 0.03125, %v1547_v33  ;;  %v1552_v36 = vmul.f32 %v1550_v32, %v1550_v32  ;;  %v1582_v53 = vmul.f32 %v1819_v52, %v1550_v32 }
 0xe46   :  { %v1551_v37 = vsub.f32 %v2769_v21, %v1549_v34  ;;  %v1554_v1 = vsel %vm170_vm0, %v1552_v36, 0.0 }
 0xe47   :  { %1555 = vadd.xlane.f32.xlu0 %v1554_v1 }
 0xe48   :  { %v1553_v7 = vmul.f32 %v1551_v37, %v1551_v37  ;;  %v1583_v54 = vmul.f32 %v1819_v52, %v1551_v37 }
 0xe4a   :  { %v1557_v38 = vsel %vm170_vm0, %v1553_v7, 0.0 }
 0xe4b   :  { %1558 = vadd.xlane.f32.xlu1 %v1557_v38 }
 0xed0   :  { %v1556_v41 = vpop.xlane.xlu0 %1555 }
 0xed1   :  { %v1560_v42 = vmul.f32 0.032258064, %v1556_v41 }
 0xed3   :  { %2134 = vrsqrt.f32 %v1560_v42  ;;  %vm1564_vm10 = vcmp.eq.f32.partialorder %v1560_v42, inf  ;;  %v1567_v47 = vand.u32 2147483648, %v1560_v42  ;;  %vm1566_vm11 = vcmp.eq.f32.partialorder %v1560_v42, 0.0 }
 0xed4   :  { %v1559_v43 = vpop.xlane.xlu1 %1558 }
 0xed5   :  { %v1561_v44 = vmul.f32 0.032258064, %v1559_v43 }
 0xed7   :  { %2136 = vrsqrt.f32 %v1561_v44  ;;  %vm1571_vm12 = vcmp.eq.f32.partialorder %v1561_v44, inf  ;;  %v1574_v49 = vand.u32 2147483648, %v1561_v44  ;;  %vm1573_vm13 = vcmp.eq.f32.partialorder %v1561_v44, 0.0 }
 0xee0   :  { %v2135_v45 = vpop.eup %2134 }
 0xee1   :  { %v1563_v46 = vmul.f32 %v2135_v45, %v1560_v42 }
 0xee3   :  { %v1565_v48 = vsel %vm1564_vm10, %v1560_v42, %v1563_v46 }
 0xee4   :  { %v2137_v14 = vpop.eup %2136  ;;  %v1568_v35 = vsel %vm1566_vm11, %v1567_v47, %v1565_v48 }
 0xee5   :  { %v1584_v19 = vadd.f32 1e-06, %v1568_v35  ;;  %v1570_v61 = vmul.f32 %v2137_v14, %v1561_v44 }
 0xee7   :  { %2138 = vrcp.f32 %v1584_v19  ;;  %v1572_v50 = vsel %vm1571_vm12, %v1561_v44, %v1570_v61 }
 0xee8   :  { %v1575_v29 = vsel %vm1573_vm13, %v1574_v49, %v1572_v50 }
 0xee9   :  { %v1585_v51 = vadd.f32 1e-06, %v1575_v29 }
 0xeeb   :  { %2140 = vrcp.f32 %v1585_v51 }
 0xef4   :  { %v2139_v13 = vpop.eup %2138 }
 0xef5   :  { %v1587_v55 = vmul.f32 %v2139_v13, %v1582_v53 }
 0xef7   :  { %v1596_v8 = vadd.f32 %v1820_v57, %v1587_v55 }
 0xef8   :  { %v2141_v56 = vpop.eup %2140 }
 0xef9   :  { %v1589_v58 = vmul.f32 %v2141_v56, %v1583_v54 }
 0xefb   :  { %v1597_v59 = vadd.f32 %v1820_v57, %v1589_v58 }
 0xefd   :  { %v1598_v60 = vpack.c.bf16 %v1597_v59, %v1596_v8 }
 0xeff   :  { %2047 = vmatmul.mubr.msk.bf16.vlgmr.msra.gmra.mxu1 %vm170_vm0, %v1598_v60 }
 0xfbf   :  { %v1659_v3 = vpop.f32.mrf.mxu1 }
 0xfc0   :  { %v1660_v5 = vadd.f32 %v1821_v2, %v1659_v3 }
 0xfc1   :  { %v2048_v4 = vpop.f32.mrf.mxu1 }
 0xfc2   :  { %v1666_v12 = vmax.f32 %v1660_v5, 0.0 }
 0xfc3   :  { %v1662_v6 = vpop.f32.mrf.mxu1 }
 0xfc4   :  { %v1663_v9 = vadd.f32 %v1821_v2, %v1662_v6 }
 0xfc5   :  { %v2049_v10 = vpop.f32.mrf.mxu1 }
 0xfc6   :  { %v1667_v17 = vmax.f32 %v1663_v9, 0.0 }
 0xfc8   :  { %v1668_v18 = vpack.c.bf16 %v1667_v17, %v1666_v12 }
 0xfca   :  { %2059 = vmatmul.mubr.msk.bf16.vlgmr.msra.gmra.mxu0 %vm1708_vm14, %v1668_v18 }
0x108a   :  { %v1746_v20 = vpop.f32.mrf.mxu0 }
0x108b   :  { %v1747_v22 = vadd.f32 %v1825_v16, %v1746_v20 }
0x108c   :  { %v2060_v23 = vpop.f32.mrf.mxu0 }
0x108d   :  { %v1753_v25 = vadd.f32 %v1747_v22, %v2763_v24 }
0x108e   :  { %v1749_v26 = vpop.f32.mrf.mxu0 }
0x108f   :  { %1755 = vst.msk [vmem:[#allocation16] sm:$0xff] %vm170_vm0, %v1753_v25  ;;  %v1750_v27 = vadd.f32 %v1825_v16, %v1749_v26 }
0x1090   :  { %v2061_v28 = vpop.f32.mrf.mxu0 }
0x1091   :  { %v1754_v30 = vadd.f32 %v1750_v27, %v2769_v21 }
0x1093   :  { %1756 = vst.msk [vmem:[#allocation16 + $0x8] sm:$0xff] %vm170_vm0, %v1754_v30 }
0x1094   :  { %2313 = shalt.err (!%p2310_p2)
}
0x1095   :  { %s2352_s17 = smov 128   ;;  %s2353_s27 = smov 8  }
0x1096   :  { %1768 = dma.vmem_to_hbm [thread:$0]  %s1763_s16, 256, %s2831_s18, [#allocation4], %s2352_s17, %s2352_s17, %s2353_s27  }
0x1097   :  { %2332 = dma.done.wait [#allocation4], 256  }
0x1098   :  { %2333 = vsyncadd [#allocation4], 4294967040 }
0x1099   :  { %1772 = vsyncpa [#allocation3], 1 }
0x109a   :  { %1773 = vsyncpa [#allocation6], 1 }
0x109b   :  { %1774 = vsyncpa [#allocation9], 1 }
0x109c   :  { %1775 = vsyncpa [#allocation12], 1 }
0x109d   :  { %1776 = vsyncpa [#allocation15], 1 }
0x109e   :  { %1777 = vsyncpa [#allocation4], 1 }

</bundles_post_ra>
